<compile_context>
chip_gen: v7x
topology: tpu7x:2x2x1
jax: 0.10.0
libtpu: 0.0.40
codegen_flags: <defaults>
</compile_context>

<pallas_src>
import jax
import jax.numpy as jnp
from jax import lax
from jax.experimental import pallas as pl
from jax.experimental.pallas import tpu as pltpu


def _round_up(x, m):
    return ((x + m - 1) // m) * m


def _make_kernel(QT, KT, HC, n_h_chunks):
    """Builds the per-(batch, q-block, k-block) kernel body."""

    def kernel(vlen_ref,                    # scalar prefetch (SMEM): (B,) int32
               wq_ref, wk_ref, wv_ref,      # weights, VMEM-resident (constant index_map)
               qT_ref, kT_ref, v_ref,       # per-step tiles
               out_ref,                     # (1, QT, Dv_p)
               qhT_sc, khT_sc, m_sc, l_sc, acc_sc):
        b = pl.program_id(0)
        ki = pl.program_id(2)

        @pl.when(ki == 0)
        def _init():
            # Query projection computed once per (batch, q-block), reused for
            # every K tile:  (H_p, Dq_p) @ (Dq_p, QT) -> (H_p, QT)   [MXU]
            qhT_sc[...] = jnp.dot(wq_ref[...], qT_ref[0],
                                  preferred_element_type=jnp.float32)
            m_sc[...] = jnp.full(m_sc.shape, -1e30, jnp.float32)
            l_sc[...] = jnp.zeros_like(l_sc)
            acc_sc[...] = jnp.zeros_like(acc_sc)

        # Key projection for this K tile: (H_p, Dk_p) @ (Dk_p, KT) -> (H_p, KT)
        khT_sc[...] = jnp.dot(wk_ref[...], kT_ref[0],
                              preferred_element_type=jnp.float32)

        # scores[q, k] = sum_h w_v[h] * tanh(qh[h, q] + kh[h, k])
        # H sits on the leading (untiled) axis, so the reduction is a plain
        # VPU FMA accumulation of (QT, KT) slabs (K on lanes) — no XLU lane
        # reduce and no lane-sparse intermediate.  The tanh dominates: this
        # kernel is EUP-bound, everything else rides along for free.
        def h_chunk(off):
            qh_c = qhT_sc[pl.ds(off, HC), :]            # (HC, QT)
            kh_c = khT_sc[pl.ds(off, HC), :]            # (HC, KT)
            wv_c = wv_ref[pl.ds(off, HC), :]            # (HC, 1)
            feat = jnp.tanh(qh_c[:, :, None] + kh_c[:, None, :])   # (HC, QT, KT)
            return jnp.sum(feat * wv_c[:, :, None], axis=0)        # (QT, KT)

        if n_h_chunks == 1:
            # Common case (H <= 32): fully inlined, no loop overhead.
            scores = h_chunk(0)
        else:
            def h_body(c, acc):
                off = pl.multiple_of(c * HC, HC)
                return acc + h_chunk(off)
            scores = lax.fori_loop(0, n_h_chunks, h_body,
                                   jnp.zeros((QT, KT), jnp.float32),
                                   unroll=(n_h_chunks <= 8))

        # Masked online softmax over the key axis (per-batch 1-D valid_lens).
        vl = vlen_ref[b]
        col = ki * KT + lax.broadcasted_iota(jnp.int32, (QT, KT), 1)
        scores = jnp.where(col < vl, scores, jnp.float32(-1e6))

        m_prev = m_sc[...]
        m_new = jnp.maximum(m_prev, jnp.max(scores, axis=-1, keepdims=True))
        alpha = jnp.exp(m_prev - m_new)
        p = jnp.exp(scores - m_new)
        l_sc[...] = alpha * l_sc[...] + jnp.sum(p, axis=-1, keepdims=True)
        acc_sc[...] = alpha * acc_sc[...] + jnp.dot(
            p, v_ref[0], preferred_element_type=jnp.float32)
        m_sc[...] = m_new

        # TODO(synk): dropout on attention weights is identity here (eval mode);
        # per-query 2-D valid_lens is not supported (only per-batch 1-D).
        @pl.when(ki == pl.num_programs(2) - 1)
        def _finalize():
            inv_l = pl.reciprocal(l_sc[...], approx=True)   # EUP vrcp
            out_ref[0] = (acc_sc[...] * inv_l).astype(out_ref.dtype)

    return kernel


def additive_attention(queries, keys, values, valid_lens, W_q, W_k, w_v):
    """queries (B,Qn,Dq), keys (B,Kn,Dk), values (B,Kn,Dv), valid_lens (B,),
    W_q (H,Dq), W_k (H,Dk), w_v (1,H)  ->  (B, Qn, Dv) float32."""
    B, Qn, Dq = queries.shape
    _, Kn, Dk = keys.shape
    _, _, Dv = values.shape
    H = W_q.shape[0]
    assert W_k.shape == (H, Dk) and w_v.shape == (1, H)

    f32 = jnp.float32

    # ---- lane/sublane-friendly padded sizes (wrapper-side layout plumbing) ----
    Dq_p = _round_up(Dq, 128)
    Dk_p = _round_up(Dk, 128)
    Dv_p = _round_up(Dv, 128)                 # lane-dense output -> unmasked stores
    H_p = _round_up(H, 8) if H <= 32 else _round_up(H, 32)
    HC = min(H_p, 32)                         # H chunk bounds the live (HC,QT,KT) tanh tile
    n_h_chunks = H_p // HC

    QT = 128 if Qn > 128 else _round_up(Qn, 8)     # sublane axis of scores/out
    Qn_p = _round_up(Qn, QT)
    KT = 256 if Kn > 256 else _round_up(Kn, 8)     # lane axis of scores
    Kn_p = _round_up(Kn, KT)

    def pad_to(x, shape):
        return jnp.pad(x.astype(f32), [(0, s - d) for d, s in zip(x.shape, shape)])

    # Feature-major (pre-transposed) q/k so the kernel never transposes:
    # projections run as W @ x^T directly on the MXU.
    qT = jnp.swapaxes(pad_to(queries, (B, Qn_p, Dq_p)), 1, 2)     # (B, Dq_p, Qn_p)
    kT = jnp.swapaxes(pad_to(keys, (B, Kn_p, Dk_p)), 1, 2)        # (B, Dk_p, Kn_p)
    v = pad_to(values, (B, Kn_p, Dv_p))                           # (B, Kn_p, Dv_p)

    wq = pad_to(W_q, (H_p, Dq_p))
    wk = pad_to(W_k, (H_p, Dk_p))
    wv = pad_to(w_v.T, (H_p, 1))                                  # (H_p, 1)

    kernel = _make_kernel(QT, KT, HC, n_h_chunks)

    grid = (B, Qn_p // QT, Kn_p // KT)        # batch & q-block parallel, K arbitrary
    grid_spec = pltpu.PrefetchScalarGridSpec(
        num_scalar_prefetch=1,
        grid=grid,
        in_specs=[
            pl.BlockSpec((H_p, Dq_p), lambda b, qi, ki, vl: (0, 0)),        # W_q
            pl.BlockSpec((H_p, Dk_p), lambda b, qi, ki, vl: (0, 0)),        # W_k
            pl.BlockSpec((H_p, 1), lambda b, qi, ki, vl: (0, 0)),           # w_v
            pl.BlockSpec((1, Dq_p, QT), lambda b, qi, ki, vl: (b, 0, qi)),  # q^T tile
            pl.BlockSpec((1, Dk_p, KT), lambda b, qi, ki, vl: (b, 0, ki)),  # k^T tile
            pl.BlockSpec((1, KT, Dv_p), lambda b, qi, ki, vl: (b, ki, 0)),  # v tile
        ],
        out_specs=pl.BlockSpec((1, QT, Dv_p), lambda b, qi, ki, vl: (b, qi, 0)),
        scratch_shapes=[
            pltpu.VMEM((H_p, QT), f32),      # cached q^T projection
            pltpu.VMEM((H_p, KT), f32),      # k^T projection (per K step)
            pltpu.VMEM((QT, 1), f32),        # running max
            pltpu.VMEM((QT, 1), f32),        # running sum
            pltpu.VMEM((QT, Dv_p), f32),     # output accumulator
        ],
    )

    out_padded = pl.pallas_call(
        kernel,
        out_shape=jax.ShapeDtypeStruct((B, Qn_p, Dv_p), f32),
        grid_spec=grid_spec,
        compiler_params=pltpu.CompilerParams(
            dimension_semantics=("parallel", "parallel", "arbitrary"),
            vmem_limit_bytes=64 << 20),
    )(valid_lens.astype(jnp.int32), wq, wk, wv, qT, kT, v)

    return out_padded[:, :Qn, :Dv]


def _reference(queries, keys, values, valid_lens, W_q, W_k, w_v):
    qh = queries @ W_q.T
    kh = keys @ W_k.T
    feat = jnp.tanh(qh[:, :, None, :] + kh[:, None, :, :])
    scores = (feat @ w_v.T)[..., 0]                                   # (B, Qn, Kn)
    col = jnp.arange(scores.shape[-1])[None, None, :]
    mask = col < valid_lens[:, None, None]
    scores = jnp.where(mask, scores, -1e6)
    attn = jax.nn.softmax(scores, axis=-1)
    return attn @ values


if __name__ == "__main__":
    B, Qn, Kn = 2, 6, 8
    Dq, Dk, Dv, H = 20, 16, 24, 32

    key = jax.random.PRNGKey(0)
    kq, kk, kv, kwq, kwk, kwv = jax.random.split(key, 6)

    queries = jax.random.normal(kq, (B, Qn, Dq), dtype=jnp.float32)
    keys = jax.random.normal(kk, (B, Kn, Dk), dtype=jnp.float32)
    values = jax.random.normal(kv, (B, Kn, Dv), dtype=jnp.float32)
    valid_lens = jnp.array([3, 7], dtype=jnp.int32)

    # Deterministic parameter init (PyTorch nn.Linear-style uniform bounds).
    W_q = jax.random.uniform(kwq, (H, Dq), jnp.float32,
                             -1.0 / Dq ** 0.5, 1.0 / Dq ** 0.5)
    W_k = jax.random.uniform(kwk, (H, Dk), jnp.float32,
                             -1.0 / Dk ** 0.5, 1.0 / Dk ** 0.5)
    w_v = jax.random.uniform(kwv, (1, H), jnp.float32,
                             -1.0 / H ** 0.5, 1.0 / H ** 0.5)

    out = additive_attention(queries, keys, values, valid_lens, W_q, W_k, w_v)
    jax.block_until_ready(out)

    ref = _reference(queries, keys, values, valid_lens, W_q, W_k, w_v)
    # slightly looser tolerance to accommodate the approximate EUP reciprocal
    assert jnp.allclose(out, ref, atol=2e-3, rtol=2e-3), "mismatch vs reference"

    print("KERNEL_OK")
</pallas_src>

<mosaic_0001>
module attributes {stable_mosaic.version = 11 : i64} {
  func.func @kernel(%arg0: i32, %arg1: i32, %arg2: i32, %arg3: memref<2xi32, #tpu.memory_space<smem>>, %arg4: memref<32x128xf32, #tpu.memory_space<vmem>>, %arg5: memref<32x128xf32, #tpu.memory_space<vmem>>, %arg6: memref<32x1xf32, #tpu.memory_space<vmem>>, %arg7: memref<1x128x8xf32, #tpu.memory_space<vmem>>, %arg8: memref<1x128x8xf32, #tpu.memory_space<vmem>>, %arg9: memref<1x8x128xf32, #tpu.memory_space<vmem>>, %arg10: memref<1x8x128xf32, #tpu.memory_space<vmem>>, %arg11: memref<32x8xf32, #tpu.memory_space<vmem>>, %arg12: memref<32x8xf32, #tpu.memory_space<vmem>>, %arg13: memref<8x1xf32, #tpu.memory_space<vmem>>, %arg14: memref<8x1xf32, #tpu.memory_space<vmem>>, %arg15: memref<8x128xf32, #tpu.memory_space<vmem>>) attributes {dimension_semantics = [#tpu.dimension_semantics<parallel>, #tpu.dimension_semantics<parallel>, #tpu.dimension_semantics<arbitrary>], iteration_bounds = array<i64: 2, 1, 1>, scalar_prefetch = 1 : i64, scratch_operands = 5 : i64, tpu.core_type = #tpu.core_type<tc>, window_params = [{pipeline_mode = #tpu.pipeline_mode<synchronous>, transform_indices = @transform_0, window_bounds = array<i64: 32, 128>}, {pipeline_mode = #tpu.pipeline_mode<synchronous>, transform_indices = @transform_1, window_bounds = array<i64: 32, 128>}, {pipeline_mode = #tpu.pipeline_mode<synchronous>, transform_indices = @transform_2, window_bounds = array<i64: 32, 1>}, {transform_indices = @transform_3, window_bounds = array<i64: 1, 128, 8>}, {transform_indices = @transform_4, window_bounds = array<i64: 1, 128, 8>}, {transform_indices = @transform_5, window_bounds = array<i64: 1, 8, 128>}, {transform_indices = @transform_6, window_bounds = array<i64: 1, 8, 128>}]} {
    %c0_i32 = arith.constant 0 : i32
    %0 = arith.cmpi eq, %arg2, %c0_i32 : i32
    %1 = arith.extui %0 : i1 to i32
    %c0_i32_0 = arith.constant 0 : i32
    %2 = arith.cmpi ne, %1, %c0_i32_0 : i32
    scf.if %2 {
      %c0_35 = arith.constant 0 : index
      %c0_36 = arith.constant 0 : index
      %58 = vector.load %arg4[%c0_35, %c0_36] : memref<32x128xf32, #tpu.memory_space<vmem>>, vector<32x128xf32>
      %c0_37 = arith.constant 0 : index
      %c0_38 = arith.constant 0 : index
      %c0_39 = arith.constant 0 : index
      %59 = vector.load %arg7[%c0_37, %c0_38, %c0_39] : memref<1x128x8xf32, #tpu.memory_space<vmem>>, vector<1x128x8xf32>
      %60 = vector.shape_cast %59 : vector<1x128x8xf32> to vector<128x8xf32>
      %cst_40 = arith.constant dense<0.000000e+00> : vector<32x8xf32>
      %61 = tpu.matmul %58, %60, %cst_40 {dimension_numbers = #tpu.dot_dimension_numbers<[1], [0], [0], [1], [0, 0, 1, 1], [], []>} : vector<32x128xf32>, vector<128x8xf32>, vector<32x8xf32> -> vector<32x8xf32>
      %c0_41 = arith.constant 0 : index
      %c0_42 = arith.constant 0 : index
      %62 = vector.load %arg11[%c0_41, %c0_42] : memref<32x8xf32, #tpu.memory_space<vmem>>, vector<32x8xf32>
      tpu.vector_store %arg11[%c0_41, %c0_42], %61 {strides = array<i32>} : memref<32x8xf32, #tpu.memory_space<vmem>>, vector<32x8xf32>,
      %cst_43 = arith.constant -1.000000e+30 : f32
      %63 = vector.broadcast %cst_43 : f32 to vector<8x1xf32>
      %c0_44 = arith.constant 0 : index
      %c0_45 = arith.constant 0 : index
      %64 = vector.load %arg13[%c0_44, %c0_45] : memref<8x1xf32, #tpu.memory_space<vmem>>, vector<8x1xf32>
      tpu.vector_store %arg13[%c0_44, %c0_45], %63 {strides = array<i32>} : memref<8x1xf32, #tpu.memory_space<vmem>>, vector<8x1xf32>,
      %cst_46 = arith.constant 0.000000e+00 : f32
      %65 = vector.broadcast %cst_46 : f32 to vector<8x1xf32>
      %c0_47 = arith.constant 0 : index
      %c0_48 = arith.constant 0 : index
      %66 = vector.load %arg14[%c0_47, %c0_48] : memref<8x1xf32, #tpu.memory_space<vmem>>, vector<8x1xf32>
      tpu.vector_store %arg14[%c0_47, %c0_48], %65 {strides = array<i32>} : memref<8x1xf32, #tpu.memory_space<vmem>>, vector<8x1xf32>,
      %cst_49 = arith.constant 0.000000e+00 : f32
      %67 = vector.broadcast %cst_49 : f32 to vector<8x128xf32>
      %c0_50 = arith.constant 0 : index
      %c0_51 = arith.constant 0 : index
      %68 = vector.load %arg15[%c0_50, %c0_51] : memref<8x128xf32, #tpu.memory_space<vmem>>, vector<8x128xf32>
      tpu.vector_store %arg15[%c0_50, %c0_51], %67 {strides = array<i32>} : memref<8x128xf32, #tpu.memory_space<vmem>>, vector<8x128xf32>,
    } else {
    }
    %c0 = arith.constant 0 : index
    %c0_1 = arith.constant 0 : index
    %3 = vector.load %arg5[%c0, %c0_1] : memref<32x128xf32, #tpu.memory_space<vmem>>, vector<32x128xf32>
    %c0_2 = arith.constant 0 : index
    %c0_3 = arith.constant 0 : index
    %c0_4 = arith.constant 0 : index
    %4 = vector.load %arg8[%c0_2, %c0_3, %c0_4] : memref<1x128x8xf32, #tpu.memory_space<vmem>>, vector<1x128x8xf32>
    %5 = vector.shape_cast %4 : vector<1x128x8xf32> to vector<128x8xf32>
    %cst = arith.constant dense<0.000000e+00> : vector<32x8xf32>
    %6 = tpu.matmul %3, %5, %cst {dimension_numbers = #tpu.dot_dimension_numbers<[1], [0], [0], [1], [0, 0, 1, 1], [], []>} : vector<32x128xf32>, vector<128x8xf32>, vector<32x8xf32> -> vector<32x8xf32>
    %c0_5 = arith.constant 0 : index
    %c0_6 = arith.constant 0 : index
    %7 = vector.load %arg12[%c0_5, %c0_6] : memref<32x8xf32, #tpu.memory_space<vmem>>, vector<32x8xf32>
    tpu.vector_store %arg12[%c0_5, %c0_6], %6 {strides = array<i32>} : memref<32x8xf32, #tpu.memory_space<vmem>>, vector<32x8xf32>,
    %c0_7 = arith.constant 0 : index
    %c0_8 = arith.constant 0 : index
    %8 = vector.load %arg11[%c0_7, %c0_8] : memref<32x8xf32, #tpu.memory_space<vmem>>, vector<32x8xf32>
    %c0_9 = arith.constant 0 : index
    %c0_10 = arith.constant 0 : index
    %9 = vector.load %arg12[%c0_9, %c0_10] : memref<32x8xf32, #tpu.memory_space<vmem>>, vector<32x8xf32>
    %c0_11 = arith.constant 0 : index
    %c0_12 = arith.constant 0 : index
    %10 = vector.load %arg6[%c0_11, %c0_12] : memref<32x1xf32, #tpu.memory_space<vmem>>, vector<32x1xf32>
    %11 = vector.shape_cast %8 : vector<32x8xf32> to vector<32x8x1xf32>
    %12 = vector.shape_cast %9 : vector<32x8xf32> to vector<32x1x8xf32>
    %13 = vector.broadcast %11 : vector<32x8x1xf32> to vector<32x8x8xf32>
    %14 = vector.broadcast %12 : vector<32x1x8xf32> to vector<32x8x8xf32>
    %15 = arith.addf %13, %14 : vector<32x8x8xf32>
    %16 = math.tanh %15 : vector<32x8x8xf32>
    %17 = vector.shape_cast %10 : vector<32x1xf32> to vector<32x1x1xf32>
    %18 = vector.broadcast %17 : vector<32x1x1xf32> to vector<32x8x8xf32>
    %19 = arith.mulf %16, %18 : vector<32x8x8xf32>
    %cst_13 = arith.constant dense<0.000000e+00> : vector<8x8xf32>
    %20 = vector.multi_reduction <add>, %19, %cst_13 [0] : vector<32x8x8xf32> to vector<8x8xf32>
    %21 = arith.index_cast %arg0 : i32 to index
    %22 = memref.load %arg3[%21] : memref<2xi32, #tpu.memory_space<smem>>
    %c8_i32 = arith.constant 8 : i32
    %23 = arith.muli %arg2, %c8_i32 : i32
    %24 = tpu.iota {dimensions = array<i32: 1>} : vector<8x8xi32>
    %25 = vector.broadcast %23 : i32 to vector<8x8xi32>
    %26 = arith.addi %25, %24 : vector<8x8xi32>
    %27 = vector.broadcast %22 : i32 to vector<8x8xi32>
    %28 = arith.cmpi slt, %26, %27 : vector<8x8xi32>
    %cst_14 = arith.constant -1.000000e+06 : f32
    %29 = vector.broadcast %cst_14 : f32 to vector<8x8xf32>
    %30 = arith.select %28, %20, %29 : vector<8x8xi1>, vector<8x8xf32>
    %c0_15 = arith.constant 0 : index
    %c0_16 = arith.constant 0 : index
    %31 = vector.load %arg13[%c0_15, %c0_16] : memref<8x1xf32, #tpu.memory_space<vmem>>, vector<8x1xf32>
    %cst_17 = arith.constant dense<0xFF800000> : vector<8xf32>
    %32 = vector.multi_reduction <maximumf>, %30, %cst_17 [1] : vector<8x8xf32> to vector<8xf32>
    %33 = vector.shape_cast %32 : vector<8xf32> to vector<8x1xf32>
    %34 = arith.maximumf %31, %33 : vector<8x1xf32>
    %35 = arith.subf %31, %34 : vector<8x1xf32>
    %36 = math.exp %35 : vector<8x1xf32>
    %37 = vector.broadcast %34 : vector<8x1xf32> to vector<8x8xf32>
    %38 = arith.subf %30, %37 : vector<8x8xf32>
    %39 = math.exp %38 : vector<8x8xf32>
    %c0_18 = arith.constant 0 : index
    %c0_19 = arith.constant 0 : index
    %40 = vector.load %arg14[%c0_18, %c0_19] : memref<8x1xf32, #tpu.memory_space<vmem>>, vector<8x1xf32>
    %41 = arith.mulf %36, %40 : vector<8x1xf32>
    %cst_20 = arith.constant dense<0.000000e+00> : vector<8xf32>
    %42 = vector.multi_reduction <add>, %39, %cst_20 [1] : vector<8x8xf32> to vector<8xf32>
    %43 = vector.shape_cast %42 : vector<8xf32> to vector<8x1xf32>
    %44 = arith.addf %41, %43 : vector<8x1xf32>
    %c0_21 = arith.constant 0 : index
    %c0_22 = arith.constant 0 : index
    %45 = vector.load %arg14[%c0_21, %c0_22] : memref<8x1xf32, #tpu.memory_space<vmem>>, vector<8x1xf32>
    tpu.vector_store %arg14[%c0_21, %c0_22], %44 {strides = array<i32>} : memref<8x1xf32, #tpu.memory_space<vmem>>, vector<8x1xf32>,
    %c0_23 = arith.constant 0 : index
    %c0_24 = arith.constant 0 : index
    %46 = vector.load %arg15[%c0_23, %c0_24] : memref<8x128xf32, #tpu.memory_space<vmem>>, vector<8x128xf32>
    %47 = vector.broadcast %36 : vector<8x1xf32> to vector<8x128xf32>
    %48 = arith.mulf %47, %46 : vector<8x128xf32>
    %c0_25 = arith.constant 0 : index
    %c0_26 = arith.constant 0 : index
    %c0_27 = arith.constant 0 : index
    %49 = vector.load %arg9[%c0_25, %c0_26, %c0_27] : memref<1x8x128xf32, #tpu.memory_space<vmem>>, vector<1x8x128xf32>
    %50 = vector.shape_cast %49 : vector<1x8x128xf32> to vector<8x128xf32>
    %cst_28 = arith.constant dense<0.000000e+00> : vector<8x128xf32>
    %51 = tpu.matmul %39, %50, %cst_28 {dimension_numbers = #tpu.dot_dimension_numbers<[1], [0], [0], [1], [0, 0, 1, 1], [], []>} : vector<8x8xf32>, vector<8x128xf32>, vector<8x128xf32> -> vector<8x128xf32>
    %52 = arith.addf %48, %51 : vector<8x128xf32>
    %c0_29 = arith.constant 0 : index
    %c0_30 = arith.constant 0 : index
    %53 = vector.load %arg15[%c0_29, %c0_30] : memref<8x128xf32, #tpu.memory_space<vmem>>, vector<8x128xf32>
    tpu.vector_store %arg15[%c0_29, %c0_30], %52 {strides = array<i32>} : memref<8x128xf32, #tpu.memory_space<vmem>>, vector<8x128xf32>,
    %c0_31 = arith.constant 0 : index
    %c0_32 = arith.constant 0 : index
    %54 = vector.load %arg13[%c0_31, %c0_32] : memref<8x1xf32, #tpu.memory_space<vmem>>, vector<8x1xf32>
    tpu.vector_store %arg13[%c0_31, %c0_32], %34 {strides = array<i32>} : memref<8x1xf32, #tpu.memory_space<vmem>>, vector<8x1xf32>,
    %c0_i32_33 = arith.constant 0 : i32
    %55 = arith.cmpi eq, %arg2, %c0_i32_33 : i32
    %56 = arith.extui %55 : i1 to i32
    %c0_i32_34 = arith.constant 0 : i32
    %57 = arith.cmpi ne, %56, %c0_i32_34 : i32
    scf.if %57 {
      %c0_35 = arith.constant 0 : index
      %c0_36 = arith.constant 0 : index
      %58 = vector.load %arg14[%c0_35, %c0_36] : memref<8x1xf32, #tpu.memory_space<vmem>>, vector<8x1xf32>
      %59 = tpu.reciprocal %58 {approx = true} : vector<8x1xf32> -> vector<8x1xf32>
      %c0_37 = arith.constant 0 : index
      %c0_38 = arith.constant 0 : index
      %60 = vector.load %arg15[%c0_37, %c0_38] : memref<8x128xf32, #tpu.memory_space<vmem>>, vector<8x128xf32>
      %61 = vector.broadcast %59 : vector<8x1xf32> to vector<8x128xf32>
      %62 = arith.mulf %60, %61 : vector<8x128xf32>
      %c0_39 = arith.constant 0 : index
      %c0_40 = arith.constant 0 : index
      %c0_41 = arith.constant 0 : index
      %63 = vector.load %arg10[%c0_39, %c0_40, %c0_41] : memref<1x8x128xf32, #tpu.memory_space<vmem>>, vector<1x8x128xf32>
      %64 = vector.shape_cast %63 : vector<1x8x128xf32> to vector<8x128xf32>
      %65 = vector.shape_cast %62 : vector<8x128xf32> to vector<1x8x128xf32>
      tpu.vector_store %arg10[%c0_39, %c0_40, %c0_41], %65 {strides = array<i32>} : memref<1x8x128xf32, #tpu.memory_space<vmem>>, vector<1x8x128xf32>,
    } else {
    }
    return
  }
  func.func @transform_0(%arg0: i32, %arg1: i32, %arg2: i32, %arg3: memref<2xi32, #tpu.memory_space<smem>>) -> (i32, i32) {
    %c0_i32 = arith.constant 0 : i32
    %c0_i32_0 = arith.constant 0 : i32
    %c0_i32_1 = arith.constant 0 : i32
    return %c0_i32, %c0_i32_0 : i32, i32
  }
  func.func @transform_1(%arg0: i32, %arg1: i32, %arg2: i32, %arg3: memref<2xi32, #tpu.memory_space<smem>>) -> (i32, i32) {
    %c0_i32 = arith.constant 0 : i32
    %c0_i32_0 = arith.constant 0 : i32
    %c0_i32_1 = arith.constant 0 : i32
    return %c0_i32, %c0_i32_0 : i32, i32
  }
  func.func @transform_2(%arg0: i32, %arg1: i32, %arg2: i32, %arg3: memref<2xi32, #tpu.memory_space<smem>>) -> (i32, i32) {
    %c0_i32 = arith.constant 0 : i32
    %c0_i32_0 = arith.constant 0 : i32
    %c0_i32_1 = arith.constant 0 : i32
    return %c0_i32, %c0_i32_0 : i32, i32
  }
  func.func @transform_3(%arg0: i32, %arg1: i32, %arg2: i32, %arg3: memref<2xi32, #tpu.memory_space<smem>>) -> (i32, i32, i32) {
    %c0_i32 = arith.constant 0 : i32
    %c0_i32_0 = arith.constant 0 : i32
    return %arg0, %c0_i32, %arg1 : i32, i32, i32
  }
  func.func @transform_4(%arg0: i32, %arg1: i32, %arg2: i32, %arg3: memref<2xi32, #tpu.memory_space<smem>>) -> (i32, i32, i32) {
    %c0_i32 = arith.constant 0 : i32
    %c0_i32_0 = arith.constant 0 : i32
    return %arg0, %c0_i32, %arg2 : i32, i32, i32
  }
  func.func @transform_5(%arg0: i32, %arg1: i32, %arg2: i32, %arg3: memref<2xi32, #tpu.memory_space<smem>>) -> (i32, i32, i32) {
    %c0_i32 = arith.constant 0 : i32
    %c0_i32_0 = arith.constant 0 : i32
    return %arg0, %arg2, %c0_i32 : i32, i32, i32
  }
  func.func @transform_6(%arg0: i32, %arg1: i32, %arg2: i32, %arg3: memref<2xi32, #tpu.memory_space<smem>>) -> (i32, i32, i32) {
    %c0_i32 = arith.constant 0 : i32
    %c0_i32_0 = arith.constant 0 : i32
    return %arg0, %arg1, %c0_i32 : i32, i32, i32
  }
}

</mosaic_0001>

<bundles_post_ra>
// kernel: tpu_custom_call.1
= control target key start
LH: loop header
LB: loop body
LE: loop exit
PB: predicated region body
PF: predicated region fallthrough
CT: control target
= control target key end

     0   :  { %s3674_s0 = inlined_call_operand.hbm [shape: s32[2], index: 0, kind: input, shape index: {}]   ;;  %s3675_s1 = inlined_call_operand.hbm [shape: f32[32,128], index: 1, kind: input, shape index: {}]   ;;  %s3676_s2 = inlined_call_operand.hbm [shape: f32[32,128], index: 2, kind: input, shape index: {}]   ;;  %s3677_s3 = inlined_call_operand.hbm [shape: f32[32,1], index: 3, kind: input, shape index: {}]   ;;  %s3678_s4 = inlined_call_operand.hbm [shape: f32[2,128,8], index: 4, kind: input, shape index: {}]   ;;  %s3679_s5 = inlined_call_operand.hbm [shape: f32[2,128,8], index: 5, kind: input, shape index: {}]   ;;  %s3680_s6 = inlined_call_operand.hbm [shape: f32[2,8,128], index: 6, kind: input, shape index: {}]   ;;  %s3681_s7 = inlined_call_operand.hbm [shape: f32[2,8,128], index: 7, kind: output, shape index: {}]  }
   0x1   :  { %3708 = sst [smem:[#allocation35_spill]] %s3676_s2  ;;  %s2575_s26 = scalar_lea.hbm %s3674_s0, 16 }
   0x2   :  { %3709 = sst [smem:[#allocation36_spill]] %s3678_s4  ;;  %p2576_p0 = scmp.ne.s32.totalorder %s3674_s0, %s2575_s26 }
   0x3   :  { %3710 = sst [smem:[#allocation37_spill]] %s3681_s7  ;;  %p2579_p1 = scmp.lt.u32.totalorder %s2575_s26, %s3674_s0 }
   0x5   :  { %p2581_p2 = pnand %p2579_p1, %p2576_p0 }
   0x7   :  { %2584 = shalt.err (!%p2581_p2)  }
   0x8   :  { %s2857_s8 = smov [#allocation8]  }
   0x9   :  { %13 = dma.hbm_to_smem %s3674_s0, 16, %s2857_s8, [#allocation7] }
   0xa   :  { %2811 = dma.done.wait [#allocation7], 16 }
   0xb   :  { %2812 = vsyncadd [#allocation7], 4294967280 }
   0xc   :  { %15 = sfence }
   0xd   :  { %16 = vsyncpa [#allocation10], 0 }
   0xe   :  { %17 = vsyncpa [#allocation13], 0 }
   0xf   :  { %18 = vsyncpa [#allocation16], 0 }
  0x10   :  { %20 = vsyncpa [#allocation16 + $0x1], 0 }
  0x11   :  { %21 = vsyncpa [#allocation19], 0 }
  0x12   :  { %23 = vsyncpa [#allocation19 + $0x1], 0 }
  0x13   :  { %24 = vsyncpa [#allocation11], 0 }
  0x14   :  { %26 = vsyncpa [#allocation11 + $0x1], 0  ;;  %s2924_s11 = smov 0   ;;  %s2926_s12 = smov 0  }
  0x15   :  { %s2928_s13 = smov 0   ;;  %s2930_s14 = smov 0  }
  0x16   :  { %s2932_s0 = smov 0   ;;  %s2934_s15 = smov 0  }
  0x17 LB: > { %3711 = sst [smem:[#allocation27_spill]] %s2835_s11  ;;  %s2955_s16 = sadd.s32 4294967295, %s2855_s15   ;;  %s2855_s15 = sphi %s2934_s15, %s32_s15   ;;  %s2851_s0 = sphi %s2932_s0, %s3764_s0   ;;  %s2847_s14 = sphi %s2930_s14, %s3763_s14   ;;  %s2843_s13 = sphi %s2928_s13, %s3759_s13   ;;  %s2839_s12 = sphi %s2926_s12, %s3762_s12   ;;  %s2835_s11 = sphi %s2924_s11, %s3761_s11  }
  0x18   : > { %3712 = sst [smem:[#allocation28_spill]] %s2843_s13  ;;  %s2169_s17 = sadd.s32 4294967294, %s2855_s15  }
  0x19   : > { %3713 = sst [smem:[#allocation29_spill]] %s2847_s14  ;;  %p130_p3 = scmp.ne.s32.totalorder %s2843_s13, %s2839_s12 }
  0x1a   : > { %p131_p4 = scmp.eq.s32.totalorder %s2855_s15, 0  ;;  %p136_p5 = scmp.ne.s32.totalorder %s2839_s12, %s2835_s11 }
  0x1b   : > { %p3682_p6 = scmp.eq.s32.totalorder %s2955_s16, 0  ;;  %p218_p7 = scmp.eq.s32.totalorder %s2955_s16, 1 }
  0x1c   : > { %p2966_p8 = por %p131_p4, %p130_p3  ;;  %p224_p9 = scmp.eq.s32.totalorder %s2169_s17, 1 }
  0x1d   : > { %p2972_p10 = por %p3682_p6, %p136_p5  ;;  %p2976_p11 = por %p218_p7, %p130_p3 }
  0x1e   : > { %s3714_s19 = scalar_select %p2966_p8, 1, 0 }
  0x1f   : > { %s3715_s20 = scalar_select %p2972_p10, 1, 0 }
  0x20   : > { %s3717_s21 = scalar_select %p2976_p11, 1, 0 }
  0x21   : > { %3716 = sst [smem:[#allocation30_spill]] %s3715_s20  ;;  %p2980_p12 = por %p224_p9, %p136_p5 }
  0x22   : > { %3718 = sst [smem:[#allocation31_spill]] %s3717_s21  ;;  %p2170_p13 = scmp.ge.s32.totalorder %s2855_s15, 1 }
  0x23   : > { %s3719_s22 = scalar_select %p2980_p12, 1, 0 }
  0x24   : > { %p231_p0 = scmp.lt.s32.totalorder %s2855_s15, 3  ;;  %s2858_s24 = smov [#allocation12]  }
  0x25   : > { %3720 = sst [smem:[#allocation32_spill]] %s3719_s22  ;;  %s256_s25 = sshll.u32 %s2858_s24, 4  ;;  %s257_s25 = int_to_ptr.vmem [resolvable:$true] %s256_s25 }
  0x26   : > { %p2986_p1 = pnand %p2170_p13, %p231_p0  ;;  %s51_s27 = sadd.s32 1, %s2851_s0 }
  0x27   : > { %p3002_p5 = scmp.ge.s32.totalorder %s51_s27, 2  ;;  %s3724_s2 = sld [smem:[#allocation35_spill]] }
  0x28   : > { %s3721_s23 = scalar_select %p2986_p1, 1, 0 }
  0x29   : > { %p2405_p4 = pneg %p2986_p1 }
  0x2a   : > { %s3723_s29 = scalar_select %p3002_p5, 1, 0 }
  0x2b   : > { %p2996_p7 = pnand %p2405_p4, %p3682_p6 }
  0x2d   : > { %s3722_s26 = scalar_select %p2996_p7, 1, 0 }
  0x2e   : > { %s2585_s9 = scalar_lea.hbm %s3724_s2, 512  ;;  %p3014_p13 = pneg %p2996_p7 }
  0x2f   : > { %p2586_p9 = scmp.ne.s32.totalorder %s3724_s2, %s2585_s9  ;;  %p2592_p2 = scmp.lt.u32.totalorder %s2585_s9, %s3724_s2 }
  0x30   : > { %s3725_s24 = scalar_select %p3014_p13, 1, 0 }
  0x31   : > { %p2588_p0 = pnand %p3014_p13, %p2586_p9 }
  0x33   : > { %p2589_p4 = pneg %p2588_p0 }
  0x35   : > { %p2594_p6 = pnand %p2592_p2, %p2589_p4 }
  0x37   : > { %2597 = shalt.err (!%p2594_p6)
}
  0x38   : > { %s2598_s30 = scalar_lea.vmem %s257_s25, 512  ;;  %p2606_p10 = scmp.lt.s32.totalorder %s257_s25, %s257_s25 }
  0x39   : > { %p2599_p3 = scmp.ne.s32.totalorder %s257_s25, %s2598_s30  ;;  %p2607_p1 = scmp.lt.s32.totalorder %s2598_s30, %s2598_s30 }
  0x3b   : > { %p2601_p12 = pnand %p2599_p3, %p3014_p13  ;;  %p2608_p8 = por %p2607_p1, %p2606_p10 }
  0x3d   : > { %p2602_p11 = pneg %p2601_p12 }
  0x3f   : > { %p2609_p5 = pnand %p2608_p8, %p2602_p11 }
  0x41   : > { %2612 = shalt.err (!%p2609_p5)
}
  0x42   : > { %s3694_s8 = smov 128   ;;  %s3696_s18 = smov 8  }
  0x43   : > { %2411 = dma.hbm_to_vmem [thread:$0]  (!%p2996_p7), %s3724_s2, 512, %s257_s25, [#allocation13], %s3694_s8, %s3694_s8, %s3696_s18  }
  0x44   : > { %p3726_p6 = scmp.ne.s32.totalorder %s3723_s29, 0  ;;  %s3038_s10 = sand.u32 1, %s2843_s13  }
  0x45   : > { %s2175_s30 = sshll.u32 %s3038_s10, 7  ;;  %s2196_s22 = sshll.u32 %s2851_s0, 11 }
  0x46   : > { %s3766_s27 = smov (%p3726_p6, %s51_s27), 0  ;;  %s287_s11 = scalar_lea.vmem [#allocation15], %s2175_s30 }
  0x47   : > { %3727 = sst [smem:[#allocation33_spill]] %s3766_s27  ;;  %s118_s17 = ssub.s32 %s2851_s0, %s3766_s27 }
  0x48   : > { %p121_p8 = scmp.eq.s32.totalorder %s118_s17, 0  ;;  %s295_s7 = sshll.u32 %s287_s11, 4  ;;  %s3054_s7 = int_to_ptr.vmem [resolvable:$true] %s295_s7 }
  0x49   : > { %s3728_s21 = sadd.s32 1, %s2843_s13  ;;  %s3730_s4 = sld [smem:[#allocation36_spill]] }
  0x4a   : > { %s3047_s14 = scalar_select %p121_p8, %s2843_s13, %s3728_s21  }
  0x4b   : > { %p3731_p10 = scmp.ne.s32.totalorder %s3714_s19, 0  ;;  %p3732_p11 = scmp.lt.s32.totalorder %s2855_s15, 2 }
  0x4c   : > { %3729 = sst [smem:[#allocation34_spill]] %s3047_s14  ;;  %s3067_s9 = scalar_lea.hbm %s3679_s5, %s2196_s22 }
  0x4d   : > { %p3060_p12 = pnand %p3732_p11, %p3731_p10  ;;  %s309_s20 = scalar_lea.vmem [#allocation17], %s2175_s30 }
  0x4e   : > { %s317_s17 = sshll.u32 %s309_s20, 4  ;;  %s3734_s28 = sand.u32 1, %s2855_s15   ;;  %s3069_s17 = int_to_ptr.vmem [resolvable:$true] %s317_s17 }
  0x4f   : > { %s3052_s25 = scalar_lea.hbm %s3730_s4, %s2196_s22  ;;  %s3073_s8 = scalar_lea.sflag [#allocation16], %s3734_s28 }
  0x50   : > { %s3733_s29 = scalar_select %p3060_p12, 1, 0 }
  0x51   : > { %s2613_s19 = scalar_lea.hbm %s3052_s25, 2048  ;;  %p3079_p2 = pneg %p3060_p12 }
  0x52   : > { %p2614_p1 = scmp.ne.s32.totalorder %s3052_s25, %s2613_s19  ;;  %s2618_s30 = scalar_lea.hbm %s3730_s4, 4096 }
  0x53   : > { %s3735_s18 = scalar_select %p3079_p2, 1, 0 }
  0x54   : > { %p2616_p3 = pnand %p3079_p2, %p2614_p1  ;;  %p2619_p9 = scmp.lt.u32.totalorder %s3052_s25, %s3730_s4 }
  0x55   : > { %p2620_p0 = scmp.lt.u32.totalorder %s2618_s30, %s2613_s19  ;;  %p2622_p6 = scmp.lt.u32.totalorder %s2613_s19, %s3052_s25 }
  0x56   : > { %p2617_p5 = pneg %p2616_p3 }
  0x57   : > { %p2621_p4 = por %p2620_p0, %p2619_p9 }
  0x59   : > { %p2623_p8 = por %p2622_p6, %p2621_p4 }
  0x5b   : > { %p2624_p10 = pnand %p2623_p8, %p2617_p5 }
  0x5d   : > { %2627 = shalt.err (!%p2624_p10)
}
  0x5e   : > { %s2628_s28 = scalar_lea.vmem %s3054_s7, 2048  ;;  %s2861_s22 = smov [#allocation15]  }
  0x5f   : > { %p2629_p11 = scmp.ne.s32.totalorder %s3054_s7, %s2628_s28  ;;  %s2633_s11 = sshll.u32 %s2861_s22, 4  ;;  %s2634_s11 = int_to_ptr.vmem [resolvable:$false] %s2633_s11 }
  0x60   : > { %s2635_s21 = scalar_lea.vmem %s2634_s11, 4096  ;;  %p2636_p7 = scmp.lt.s32.totalorder %s3054_s7, %s2634_s11 }
  0x61   : > { %p2631_p1 = pnand %p2629_p11, %p3079_p2  ;;  %p2637_p13 = scmp.lt.s32.totalorder %s2635_s21, %s2628_s28 }
  0x63   : > { %p2632_p3 = pneg %p2631_p1  ;;  %p2638_p9 = por %p2637_p13, %p2636_p7 }
  0x65   : > { %p2639_p0 = pnand %p2638_p9, %p2632_p3 }
  0x67   : > { %2642 = shalt.err (!%p2639_p0)
}
  0x68   : > { %s3736_s19 = smov 8   ;;  %s3737_s30 = smov 128  }
  0x69   : > { %2418 = dma.hbm_to_vmem [thread:$0]  (!%p3060_p12), %s3052_s25, 2048, %s3054_s7, %s3073_s8, %s3737_s30, %s3737_s30, %s3736_s19  }
  0x6a   : > { %s2862_s20 = smov [#allocation9]   ;;  %s2643_s28 = scalar_lea.hbm %s3675_s1, 512 }
  0x6b   : > { %s243_s2 = sshll.u32 %s2862_s20, 4  ;;  %p2644_p7 = scmp.ne.s32.totalorder %s3675_s1, %s2643_s28  ;;  %s244_s2 = int_to_ptr.vmem [resolvable:$true] %s243_s2 }
  0x6c   : > { %p3738_p13 = scmp.ne.s32.totalorder %s3725_s24, 0  ;;  %p2650_p6 = scmp.lt.u32.totalorder %s2643_s28, %s3675_s1 }
  0x6e   : > { %p2646_p5 = pnand %p2644_p7, %p3738_p13 }
  0x70   : > { %p2647_p4 = pneg %p2646_p5 }
  0x72   : > { %p2652_p8 = pnand %p2650_p6, %p2647_p4 }
  0x74   : > { %2655 = shalt.err (!%p2652_p8)
}
  0x75   : > { %s2656_s7 = scalar_lea.vmem %s244_s2, 512  ;;  %p2664_p3 = scmp.lt.s32.totalorder %s244_s2, %s244_s2 }
  0x76   : > { %p2657_p10 = scmp.ne.s32.totalorder %s244_s2, %s2656_s7  ;;  %p2665_p9 = scmp.lt.s32.totalorder %s2656_s7, %s2656_s7 }
  0x78   : > { %p2659_p11 = pnand %p2657_p10, %p3738_p13  ;;  %p2666_p0 = por %p2665_p9, %p2664_p3 }
  0x7a   : > { %p2660_p1 = pneg %p2659_p11 }
  0x7c   : > { %p2667_p12 = pnand %p2666_p0, %p2660_p1 }
  0x7e   : > { %2670 = shalt.err (!%p2667_p12)
}
  0x7f   : > { %p3739_p7 = scmp.ne.s32.totalorder %s3722_s26, 0  ;;  %s2863_s27 = smov [#allocation14]  }
  0x80   : > { %s269_s25 = sshll.u32 %s2863_s27, 4  ;;  %s2181_s20 = sshll.u32 %s3038_s10, 3  ;;  %s270_s25 = int_to_ptr.vmem [resolvable:$true] %s269_s25 }
  0x81   : > { %2408 = dma.hbm_to_vmem [thread:$0]  (!%p3739_p7), %s3675_s1, 512, %s244_s2, [#allocation10], %s3737_s30, %s3737_s30, %s3736_s19  }
  0x82   : > { %s2671_s11 = scalar_lea.hbm %s3677_s3, 512 }
  0x83   : > { %p2672_p12 = scmp.ne.s32.totalorder %s3677_s3, %s2671_s11  ;;  %p2678_p6 = scmp.lt.u32.totalorder %s2671_s11, %s3677_s3 }
  0x85   : > { %p2674_p5 = pnand %p2672_p12, %p3738_p13 }
  0x87   : > { %p2675_p4 = pneg %p2674_p5 }
  0x89   : > { %p2680_p8 = pnand %p2678_p6, %p2675_p4 }
  0x8b   : > { %2683 = shalt.err (!%p2680_p8)
}
  0x8c   : > { %s2684_s2 = scalar_lea.vmem %s270_s25, 512  ;;  %p2692_p3 = scmp.lt.s32.totalorder %s270_s25, %s270_s25 }
  0x8d   : > { %p2685_p10 = scmp.ne.s32.totalorder %s270_s25, %s2684_s2  ;;  %p2693_p9 = scmp.lt.s32.totalorder %s2684_s2, %s2684_s2 }
  0x8f   : > { %p2687_p11 = pnand %p2685_p10, %p3738_p13  ;;  %p2694_p0 = por %p2693_p9, %p2692_p3 }
  0x91   : > { %p2688_p1 = pneg %p2687_p11 }
  0x93   : > { %p2695_p2 = pnand %p2694_p0, %p2688_p1 }
  0x95   : > { %2698 = shalt.err (!%p2695_p2)
}
  0x96   : > { %2414 = dma.hbm_to_vmem [thread:$0]  (!%p3739_p7), %s3677_s3, 512, %s270_s25, [#allocation13], %s3737_s30, %s3737_s30, %s3736_s19  }
  0x97   : > { %s2699_s24 = scalar_lea.hbm %s3067_s9, 2048  ;;  %p3740_p12 = scmp.ne.s32.totalorder %s3735_s18, 0 }
  0x98   : > { %p2700_p13 = scmp.ne.s32.totalorder %s3067_s9, %s2699_s24  ;;  %s2704_s26 = scalar_lea.hbm %s3679_s5, 4096 }
  0x99   : > { %p2705_p2 = scmp.lt.u32.totalorder %s3067_s9, %s3679_s5  ;;  %p2706_p6 = scmp.lt.u32.totalorder %s2704_s26, %s2699_s24 }
  0x9a   : > { %p2702_p5 = pnand %p2700_p13, %p3740_p12  ;;  %p2708_p10 = scmp.lt.u32.totalorder %s2699_s24, %s3067_s9 }
  0x9b   : > { %p2707_p8 = por %p2706_p6, %p2705_p2 }
  0x9c   : > { %p2703_p4 = pneg %p2702_p5 }
  0x9d   : > { %p2709_p11 = por %p2708_p10, %p2707_p8 }
  0x9f   : > { %p2710_p1 = pnand %p2709_p11, %p2703_p4 }
  0xa1   : > { %2713 = shalt.err (!%p2710_p1)
}
  0xa2   : > { %s2714_s25 = scalar_lea.vmem %s3069_s17, 2048  ;;  %s2864_s21 = smov [#allocation17]  }
  0xa3   : > { %p2715_p7 = scmp.ne.s32.totalorder %s3069_s17, %s2714_s25  ;;  %s2719_s7 = sshll.u32 %s2864_s21, 4  ;;  %s2720_s7 = int_to_ptr.vmem [resolvable:$false] %s2719_s7 }
  0xa4   : > { %s2721_s4 = scalar_lea.vmem %s2720_s7, 4096  ;;  %p2722_p0 = scmp.lt.s32.totalorder %s3069_s17, %s2720_s7 }
  0xa5   : > { %p2717_p3 = pnand %p2715_p7, %p3740_p12  ;;  %p2723_p13 = scmp.lt.s32.totalorder %s2721_s4, %s2714_s25 }
  0xa7   : > { %p2718_p9 = pneg %p2717_p3  ;;  %p2724_p5 = por %p2723_p13, %p2722_p0 }
  0xa9   : > { %p2725_p2 = pnand %p2724_p5, %p2718_p9 }
  0xab   : > { %2728 = shalt.err (!%p2725_p2)
}
  0xac   : > { %p3741_p4 = scmp.ne.s32.totalorder %s3733_s29, 0  ;;  %s2182_s2 = sshll.u32 %s2851_s0, 7 }
  0xad   : > { %s3178_s24 = scalar_lea.hbm %s3680_s6, %s2182_s2  ;;  %s331_s27 = scalar_lea.vmem [#allocation18], %s2181_s20 }
  0xae   : > { %2421 = dma.hbm_to_vmem [thread:$0]  (!%p3741_p4), %s3067_s9, 2048, %s3069_s17, %s3073_s8, %s3737_s30, %s3737_s30, %s3736_s19  }
  0xaf   : > { %s339_s22 = sshll.u32 %s331_s27, 4  ;;  %s328_s26 = scalar_lea.sflag [#allocation19], %s3038_s10  ;;  %s340_s22 = int_to_ptr.vmem [resolvable:$true] %s339_s22 }
  0xb0   : > { %s2729_s28 = scalar_lea.hbm %s3178_s24, 128  ;;  %s2734_s17 = scalar_lea.hbm %s3680_s6, 256 }
  0xb1   : > { %p2730_p6 = scmp.ne.s32.totalorder %s3178_s24, %s2729_s28  ;;  %p2735_p11 = scmp.lt.u32.totalorder %s3178_s24, %s3680_s6 }
  0xb2   : > { %p2736_p1 = scmp.lt.u32.totalorder %s2734_s17, %s2729_s28  ;;  %p2738_p3 = scmp.lt.u32.totalorder %s2729_s28, %s3178_s24 }
  0xb3   : > { %p2732_p8 = pnand %p2730_p6, %p3740_p12 }
  0xb4   : > { %p2737_p7 = por %p2736_p1, %p2735_p11 }
  0xb5   : > { %p2733_p10 = pneg %p2732_p8 }
  0xb6   : > { %p2739_p9 = por %p2738_p3, %p2737_p7 }
  0xb8   : > { %p2740_p0 = pnand %p2739_p9, %p2733_p10 }
  0xba   : > { %2743 = shalt.err (!%p2740_p0)
}
  0xbb   : > { %s2744_s10 = scalar_lea.vmem %s340_s22, 128  ;;  %s2865_s20 = smov [#allocation18]  }
  0xbc   : > { %p2745_p13 = scmp.ne.s32.totalorder %s340_s22, %s2744_s10  ;;  %s2749_s11 = sshll.u32 %s2865_s20, 4  ;;  %s2750_s11 = int_to_ptr.vmem [resolvable:$false] %s2749_s11 }
  0xbd   : > { %s2751_s25 = scalar_lea.vmem %s2750_s11, 256  ;;  %p2752_p6 = scmp.lt.s32.totalorder %s340_s22, %s2750_s11 }
  0xbe   : > { %p2747_p5 = pnand %p2745_p13, %p3740_p12  ;;  %p2753_p8 = scmp.lt.s32.totalorder %s2751_s25, %s2744_s10 }
  0xc0   : > { %p2748_p2 = pneg %p2747_p5  ;;  %p2754_p4 = por %p2753_p8, %p2752_p6 }
  0xc2   : > { %p2755_p1 = pnand %p2754_p4, %p2748_p2 }
  0xc4   : > { %2758 = shalt.err (!%p2755_p1)
}
  0xc5   : > { %p3742_p11 = scmp.ne.s32.totalorder %s3733_s29, 0  ;;  %p3743_p10 = scmp.ne.s32.totalorder %s3721_s23, 0 }
  0xc6   : > { %p3744_p7 = scmp.eq.s32.totalorder (!%p3743_p10), %s2955_s16, 0 }
  0xc7   : > { %2424 = dma.hbm_to_vmem [thread:$0]  (!%p3742_p11), %s3178_s24, 128, %s340_s22, %s328_s26  }
  0xc8   : > { %348 = sbr.rel (%p3743_p10) target bundleno = 1330 (0x532), region = 44 }
  0xcf   : > { %2814 = dma.done.wait (%p3744_p7), [#allocation10], 512   ;;  %p3745_p12 = pmov %p3744_p7 }
  0xd0   : > { %p3746_p3 = pmov %p3744_p7 }
  0xd1   : > { %2816 = vsyncadd (%p3745_p12), [#allocation10], 4294966784 }
  0xd2   : > { %2818 = dma.done.wait (%p3746_p3), [#allocation13], 1024   ;;  %p3747_p9 = pmov %p3746_p3 }
  0xd3   : > { %s3748_s18 = sld [smem:[#allocation30_spill]]  ;;  %s362_s29 = sand.u32 1, %s2955_s16  }
  0xd4   : > { %2820 = vsyncadd (%p3747_p9), [#allocation13], 4294966272  ;;  %s3212_s21 = sand.u32 1, %s2839_s12   ;;  %s363_s7 = scalar_lea.sflag [#allocation16], %s362_s29 }
  0xd5   : > { %s2187_s23 = sshll.u32 %s3212_s21, 7 }
  0xd6   : > { %s3215_s4 = scalar_lea.vmem [#allocation15], %s2187_s23 }
  0xd9   : > { %p3749_p4 = scmp.ne.s32.totalorder %s3748_s18, 0 }
  0xdb   : > { %2822 = dma.done.wait (%p3749_p4), %s363_s7, 4096  }
  0xdc   : > { %2824 = vsyncadd (%p3749_p4), %s363_s7, 4294963200  ;;  %s2189_s2 = sshll.u32 %s3212_s21, 3  ;;  %s3222_s13 = scalar_lea.vmem [#allocation17], %s2187_s23 }
  0xdd   : > { %s381_s16 = scalar_lea.sflag [#allocation19], %s3212_s21  ;;  %s3227_s14 = scalar_lea.vmem [#allocation18], %s2189_s2 }
  0xde   : > { %2826 = dma.done.wait (%p3749_p4), %s381_s16, 128  }
  0xdf   : > { %2828 = vsyncadd (%p3749_p4), %s381_s16, 4294967168  ;;  %v2866_v0 = vmov 0   ;;  %v431_v1 = vld [vmem:[%s3215_s4] sm:$0xff]  ;;  %v432_v2 = vld [vmem:[%s3215_s4 + $0x8] sm:$0xff]  ;;  %v663_v6 = vlaneseq  ;;  %v2867_v7 = vmov 1966171168  }
  0xe0   : > { %2496 = vset.pattern.permute.xlu1 %v2866_v0  ;;  %2497 = vset.pattern.permute.xlu0 %v2866_v0  ;;  %v433_v3 = vld [vmem:[%s3215_s4 + $0x10] sm:$0xff]  ;;  %v2321_v4 = vpack.c.bf16 %v432_v2, %v431_v1  ;;  %v434_v5 = vld [vmem:[%s3215_s4 + $0x18] sm:$0xff]  ;;  %v893_v8 = vunpack.c.l.s4 %v2867_v7  ;;  %v435_v10 = vld [vmem:[%s3215_s4 + $0x20] sm:$0xff]  ;;  %vm532_vm0 = vcmask 64512   ;;  %vm537_vm1 = vcmask 7168   ;;  %s3750_s24 = sld [smem:[#allocation29_spill]] }
  0xe1   : > { %v2325_v9 = vpack.c.bf16 %v434_v5, %v433_v3  ;;  %v436_v11 = vld [vmem:[%s3215_s4 + $0x28] sm:$0xff]  ;;  %v427_v13 = vld [vmem:[#allocation9] sm:$0xff]  ;;  %v3240_v14 = vshrl.u32 %v663_v6, 7  ;;  %v437_v16 = vld [vmem:[%s3215_s4 + $0x30] sm:$0xff]  ;;  %vm2870_vm3 = vmmov 0   ;;  %s3751_s22 = sld [smem:[#allocation31_spill]] }
  0xe2   : > { %2322 = vmatprep.subr.bf16.mxu0 %v2321_v4  ;;  %v2329_v12 = vpack.c.bf16 %v436_v11, %v435_v10  ;;  %v894_v15 = vunpack.c.0.s8 %v893_v8  ;;  %v438_v17 = vld [vmem:[%s3215_s4 + $0x38] sm:$0xff]  ;;  %2272 = vmatprep.mubr.f32.mxu0 %v427_v13  ;;  %v545_v18 = vld [vmem:[%s3222_s13] sm:$0xff]  ;;  %v546_v19 = vld [vmem:[%s3222_s13 + $0x8] sm:$0xff]  ;;  %s422_s28 = scalar_lea.vmem [#allocation20], %s2189_s2  ;;  %s3752_s19 = sld [smem:[#allocation37_spill]] }
  0xe3   : > { %2324 = vmatpush3.bf16.msra.mxu0 %v2321_v4  ;;  %v547_v20 = vld [vmem:[%s3222_s13 + $0x10] sm:$0xff]  ;;  %v548_v21 = vld [vmem:[%s3222_s13 + $0x18] sm:$0xff]  ;;  %v2353_v22 = vpack.c.bf16 %v546_v19, %v545_v18  ;;  %v2333_v24 = vpack.c.bf16 %v438_v17, %v437_v16  ;;  %v549_v25 = vld [vmem:[%s3222_s13 + $0x20] sm:$0xff]  ;;  %v3258_v36 = vsub.s32 0, %v3240_v14  ;;  %s2007_s8 = sshll.u32 %s422_s28, 4  ;;  %s1993_s10 = scalar_lea.sflag [#allocation11], %s3212_s21  ;;  %s3627_s8 = int_to_ptr.vmem [resolvable:$true] %s2007_s8 }
  0xe4   : > { %2326 = vmatprep.subr.bf16.mxu0 %v2325_v9  ;;  %v2357_v23 = vpack.c.bf16 %v548_v21, %v547_v20  ;;  %v550_v26 = vld [vmem:[%s3222_s13 + $0x28] sm:$0xff]  ;;  %v3251_v27 = vsub.s32 %v894_v15, %v3240_v14  ;;  %v439_v28 = vld [vmem:[%s3215_s4 + $0x40] sm:$0xff]  ;;  %v551_v34 = vld [vmem:[%s3222_s13 + $0x30] sm:$0xff]  ;;  %s2759_s20 = scalar_lea.vmem %s3627_s8, 128  ;;  %s2871_s11 = smov [#allocation20]  }
  0xe5   : > { %v440_v29 = vld [vmem:[%s3215_s4 + $0x48] sm:$0xff]  ;;  %2354 = vmatprep.subr.bf16.mxu1 %v2353_v22  ;;  %v2361_v30 = vpack.c.bf16 %v550_v26, %v549_v25  ;;  %v541_v31 = vld [vmem:[#allocation12] sm:$0xff]  ;;  %v552_v35 = vld [vmem:[%s3222_s13 + $0x38] sm:$0xff]  ;;  %p2760_p0 = scmp.ne.s32.totalorder %s3627_s8, %s2759_s20  ;;  %s2763_s25 = sshll.u32 %s2871_s11, 4  ;;  %s2764_s25 = int_to_ptr.vmem [resolvable:$false] %s2763_s25 }
  0xe6   : > { %2356 = vmatpush3.bf16.msra.mxu1 %v2353_v22  ;;  %v659_v32 = vld [vmem:[#allocation14] sm:$0xff]  ;;  %v2337_v33 = vpack.c.bf16 %v440_v29, %v439_v28  ;;  %2310 = vmatprep.mubr.f32.mxu1 %v541_v31  ;;  %v441_v39 = vld [vmem:[%s3215_s4 + $0x50] sm:$0xff]  ;;  %v442_v40 = vld [vmem:[%s3215_s4 + $0x58] sm:$0xff]  ;;  %v2365_v44 = vpack.c.bf16 %v552_v35, %v551_v34  ;;  %s1862_s27 = sld [smem:[#allocation8 + %s3750_s24]]  ;;  %s2193_s26 = sshll.u32 %s3750_s24, 7 }
  0xe7   : > { %2328 = vmatpush3.bf16.msra.mxu0 %v2325_v9  ;;  %2358 = vmatprep.subr.bf16.mxu1 %v2357_v23  ;;  %v1322_v37 = vrot.slane %v659_v32, %v3251_v27  ;;  %v1315_v38 = vcombine.high %v659_v32, %v659_v32  ;;  %v2341_v45 = vpack.c.bf16 %v442_v40, %v441_v39  ;;  %v553_v46 = vld [vmem:[%s3222_s13 + $0x40] sm:$0xff]  ;;  %v554_v47 = vld [vmem:[%s3222_s13 + $0x48] sm:$0xff]  ;;  %v555_v57 = vld [vmem:[%s3222_s13 + $0x50] sm:$0xff]  ;;  %p3753_p13 = scmp.ne.s32.totalorder %s3751_s22, 0  ;;  %s2765_s18 = scalar_lea.vmem %s2764_s25, 256 }
  0xe8   : > { %2330 = vmatprep.subr.bf16.mxu0 %v2329_v12  ;;  %v443_v50 = vld [vmem:[%s3215_s4 + $0x60] sm:$0xff]  ;;  %v444_v51 = vld [vmem:[%s3215_s4 + $0x68] sm:$0xff]  ;;  %v2369_v55 = vpack.c.bf16 %v554_v47, %v553_v46  ;;  %v556_v58 = vld [vmem:[%s3222_s13 + $0x58] sm:$0xff]  ;;  %s3625_s30 = scalar_lea.hbm %s3752_s19, %s2193_s26  ;;  %p2766_p6 = scmp.lt.s32.totalorder %s3627_s8, %s2764_s25 }
  0xe9   : > { %v1338_v41 = vrot.slane %v1322_v37, %v3251_v27  ;;  %v1330_v42 = vcombine.high %v1322_v37, %v1322_v37  ;;  %v1329_v43 = vrot.slane %v1315_v38, %v3251_v27  ;;  %v2345_v56 = vpack.c.bf16 %v444_v51, %v443_v50  ;;  %v445_v59 = vld [vmem:[%s3215_s4 + $0x70] sm:$0xff]  ;;  %v446_v60 = vld [vmem:[%s3215_s4 + $0x78] sm:$0xff]  ;;  %v557_v2 = vld [vmem:[%s3222_s13 + $0x60] sm:$0xff]  ;;  %p2761_p5 = pnand %p2760_p0, %p3753_p13  ;;  %p2767_p8 = scmp.lt.s32.totalorder %s2765_s18, %s2759_s20 }
  0xea   : > { %2360 = vmatpush3.bf16.msra.mxu1 %v2357_v23  ;;  %v2373_v63 = vpack.c.bf16 %v556_v58, %v555_v57  ;;  %v2349_v1 = vpack.c.bf16 %v446_v60, %v445_v59  ;;  %v558_v3 = vld [vmem:[%s3222_s13 + $0x68] sm:$0xff]  ;;  %v559_v8 = vld [vmem:[%s3222_s13 + $0x70] sm:$0xff]  ;;  %v560_v9 = vld [vmem:[%s3222_s13 + $0x78] sm:$0xff]  ;;  %v3314_v58 = vsub.s32 1, %v3240_v14 }
  0xeb   : > { %2332 = vmatpush3.bf16.msra.mxu0 %v2329_v12  ;;  %2362 = vmatprep.subr.bf16.mxu1 %v2361_v30  ;;  %v1514_v48 = vrot.slane %v1338_v41, %v3258_v36  ;;  %v1360_v49 = vcombine.high %v1338_v41, %v1338_v41  ;;  %v1345_v53 = vrot.slane %v1329_v43, %v3251_v27  ;;  %v428_v11 = vld [vmem:[#allocation9 + $0x8] sm:$0xff]  ;;  %v429_v13 = vld [vmem:[#allocation9 + $0x10] sm:$0xff]  ;;  %v430_v18 = vld [vmem:[#allocation9 + $0x18] sm:$0xff]  ;;  %p2762_p2 = pneg %p2761_p5  ;;  %p2768_p1 = por %p2767_p8, %p2766_p6 }
  0xec   : > { %2334 = vmatprep.subr.bf16.mxu0 %v2333_v24  ;;  %v1352_v54 = vrot.slane %v1330_v42, %v3251_v27  ;;  %v1331_v4 = vcombine.high %v1329_v43, %v1329_v43  ;;  %v2377_v7 = vpack.c.bf16 %v558_v3, %v557_v2  ;;  %v2381_v12 = vpack.c.bf16 %v560_v9, %v559_v8  ;;  %v660_v17 = vld [vmem:[#allocation14 + $0x8] sm:$0xff]  ;;  %v543_v23 = vld [vmem:[#allocation12 + $0x10] sm:$0xff]  ;;  %v544_v28 = vld [vmem:[#allocation12 + $0x18] sm:$0xff] }
  0xed   : > { %1640 = vperm.xlu1 %2496, %v1514_v48   ;;  %v1522_v52 = vrot.slane %v1360_v49, %v3258_v36  ;;  %v1530_v61 = vrot.slane %v1345_v53, %v3258_v36  ;;  %v1361_v16 = vcombine.high %v1345_v53, %v1345_v53  ;;  %v1371_v21 = vrot.slane %v660_v17, %v3251_v27  ;;  %v542_v22 = vld [vmem:[#allocation12 + $0x8] sm:$0xff]  ;;  %v661_v59 = vld [vmem:[#allocation14 + $0x10] sm:$0xff]  ;;  %p2769_p11 = pnand %p2768_p1, %p2762_p2 }
  0xee   : > { %2364 = vmatpush3.bf16.msra.mxu1 %v2361_v30  ;;  %v1362_v62 = vcombine.high %v1352_v54, %v1352_v54  ;;  %v1518_v0 = vrot.slane %v1352_v54, %v3258_v36  ;;  %v1359_v10 = vrot.slane %v1331_v4, %v3251_v27 }
  0xef   : > { %2336 = vmatpush3.bf16.msra.mxu0 %v2333_v24  ;;  %2366 = vmatprep.subr.bf16.mxu1 %v2365_v44  ;;  %v1538_v19 = vrot.slane %v1361_v16, %v3258_v36  ;;  %v1387_v25 = vrot.slane %v1371_v21, %v3251_v27  ;;  %v1379_v26 = vcombine.high %v1371_v21, %v1371_v21 }
  0xf0   : > { %2338 = vmatprep.subr.bf16.mxu0 %v2337_v33  ;;  %1644 = vperm.xlu0 %2497, %v1518_v0   ;;  %v1526_v5 = vrot.slane %v1362_v62, %v3258_v36  ;;  %v1534_v15 = vrot.slane %v1359_v10, %v3258_v36  ;;  %v1363_v20 = vcombine.high %v1359_v10, %v1359_v10  ;;  %v3337_v10 = vsub.s32 4, %v3240_v14 }
  0xf1   : > { %1648 = vperm.xlu1 %2496, %v1522_v52   ;;  %v1546_v29 = vrot.slane %v1387_v25, %v3258_v36  ;;  %v1401_v30 = vrot.slane %v1379_v26, %v3251_v27  ;;  %v1409_v32 = vcombine.high %v1387_v25, %v1387_v25  ;;  %v3306_v52 = vsub.s32 2, %v3240_v14 }
  0xf2   : > { %2368 = vmatpush3.bf16.msra.mxu1 %v2365_v44  ;;  %v1542_v24 = vrot.slane %v1363_v20, %v3258_v36  ;;  %v1420_v62 = vrot.slane %v661_v59, %v3251_v27  ;;  %v3345_v20 = vsub.s32 6, %v3240_v14  ;;  %v3351_v25 = vsub.s32 7, %v3240_v14 }
  0xf3   : > { %2340 = vmatpush3.bf16.msra.mxu0 %v2337_v33  ;;  %2370 = vmatprep.subr.bf16.mxu1 %v2369_v55  ;;  %v1550_v31 = vrot.slane %v1401_v30, %v3258_v36  ;;  %v1364_v33 = vcombine.high %v660_v17, %v660_v17  ;;  %v1554_v34 = vrot.slane %v1409_v32, %v3258_v36 }
  0xf4   : > { %2342 = vmatprep.subr.bf16.mxu0 %v2341_v45  ;;  %v1411_v35 = vcombine.high %v1401_v30, %v1401_v30  ;;  %v1436_v2 = vrot.slane %v1420_v62, %v3251_v27  ;;  %v1428_v3 = vcombine.high %v1420_v62, %v1420_v62 }
  0xf5   : > { %1656 = vperm.xlu1 %2496, %v1530_v61   ;;  %v1378_v37 = vrot.slane %v1364_v33, %v3251_v27  ;;  %v3320_v61 = vsub.s32 3, %v3240_v14  ;;  %v662_v33 = vld [vmem:[#allocation14 + $0x18] sm:$0xff] }
  0xf6   : > { %2372 = vmatpush3.bf16.msra.mxu1 %v2369_v55  ;;  %v1558_v38 = vrot.slane %v1411_v35, %v3258_v36  ;;  %v1450_v8 = vrot.slane %v1428_v3, %v3251_v27 }
  0xf7   : > { %2344 = vmatpush3.bf16.msra.mxu0 %v2341_v45  ;;  %2374 = vmatprep.subr.bf16.mxu1 %v2373_v63  ;;  %v1394_v39 = vrot.slane %v1378_v37, %v3251_v27  ;;  %v1380_v40 = vcombine.high %v1378_v37, %v1378_v37  ;;  %v1469_v37 = vrot.slane %v662_v33, %v3251_v27 }
  0xf8   : > { %2346 = vmatprep.subr.bf16.mxu0 %v2345_v56  ;;  %v1460_v17 = vcombine.high %v1450_v8, %v1450_v8 }
  0xf9   : > { %1652 = vperm.xlu1 %2496, %v1526_v5   ;;  %v1562_v41 = vrot.slane %v1394_v39, %v3258_v36  ;;  %v1408_v42 = vrot.slane %v1380_v40, %v3251_v27  ;;  %v1410_v44 = vcombine.high %v1394_v39, %v1394_v39  ;;  %v1485_v40 = vrot.slane %v1469_v37, %v3251_v27 }
  0xfa   : > { %2376 = vmatpush3.bf16.msra.mxu1 %v2373_v63  ;;  %v1590_v21 = vrot.slane %v1460_v17, %v3258_v36 }
  0xfb   : > { %2348 = vmatpush3.bf16.msra.mxu0 %v2345_v56  ;;  %2378 = vmatprep.subr.bf16.mxu1 %v2377_v7  ;;  %v1566_v43 = vrot.slane %v1408_v42, %v3258_v36  ;;  %v1570_v45 = vrot.slane %v1410_v44, %v3258_v36  ;;  %v1412_v46 = vcombine.high %v1408_v42, %v1408_v42 }
  0xfc   : > { %2350 = vmatprep.subr.bf16.mxu0 %v2349_v1 }
  0xfd   : > { %1660 = vperm.xlu1 %2496, %v1534_v15   ;;  %v1574_v47 = vrot.slane %v1412_v46, %v3258_v36 }
  0xfe   : > { %2380 = vmatpush3.bf16.msra.mxu1 %v2377_v7  ;;  %v1578_v7 = vrot.slane %v1436_v2, %v3258_v36 }
  0xff   : > { %2352 = vmatpush3.bf16.msra.mxu0 %v2349_v1  ;;  %2382 = vmatprep.subr.bf16.mxu1 %v2381_v12  ;;  %v3327_v1 = vsub.s32 5, %v3240_v14 }
 0x101   : > { %1664 = vperm.xlu1 %2496, %v1538_v19  }
 0x102   : > { %2273 = vmatmul.mubr.f32.vlgmr.msra.gmra.mrb[0].mxu0 %v428_v11  ;;  %2384 = vmatpush3.bf16.msra.mxu1 %v2381_v12  ;;  %v1582_v11 = vrot.slane %v1450_v8, %v3258_v36  ;;  %v1458_v12 = vcombine.high %v1436_v2, %v1436_v2 }
 0x103   : > { %2275 = vmatprep.mubr.f32.mxu0 %v429_v13  ;;  %v1413_v13 = vcombine.high %v661_v59, %v661_v59 }
 0x104   : > { %v1586_v16 = vrot.slane %v1458_v12, %v3258_v36 }
 0x105   : > { %2311 = vmatmul.mubr.f32.vlgmr.msra.gmra.mrb[0].mxu1 %v542_v22  ;;  %1668 = vperm.xlu1 %2496, %v1542_v24  }
 0x106   : > { %2276 = vmatmul.mubr.f32.gmra.mrb[2].mxu0 %v430_v18  ;;  %2313 = vmatprep.mubr.f32.mxu1 %v543_v23  ;;  %v1427_v18 = vrot.slane %v1413_v13, %v3251_v27 }
 0x108   : > { %v1443_v22 = vrot.slane %v1427_v18, %v3251_v27  ;;  %v1429_v23 = vcombine.high %v1427_v18, %v1427_v18 }
 0x109   : > { %2314 = vmatmul.mubr.f32.gmra.mrb[2].mxu1 %v544_v28  ;;  %1672 = vperm.xlu1 %2496, %v1546_v29  }
 0x10a   : > { %v1594_v26 = vrot.slane %v1443_v22, %v3258_v36  ;;  %v1457_v28 = vrot.slane %v1429_v23, %v3251_v27  ;;  %v1459_v32 = vcombine.high %v1443_v22, %v1443_v22 }
 0x10c   : > { %v1461_v35 = vcombine.high %v1457_v28, %v1457_v28 }
 0x10d   : > { %1676 = vperm.xlu1 %2496, %v1550_v31   ;;  %v1598_v31 = vrot.slane %v1457_v28, %v3258_v36 }
 0x10e   : > { %v1606_v39 = vrot.slane %v1461_v35, %v3258_v36 }
 0x111   : > { %1680 = vperm.xlu1 %2496, %v1554_v34   ;;  %v1602_v34 = vrot.slane %v1459_v32, %v3258_v36 }
 0x115   : > { %1684 = vperm.xlu1 %2496, %v1558_v38  }
 0x119   : > { %1688 = vperm.xlu1 %2496, %v1562_v41   ;;  %v1477_v41 = vcombine.high %v1469_v37, %v1469_v37 }
 0x11b   : > { %v1499_v44 = vrot.slane %v1477_v41, %v3251_v27  ;;  %v2868_v41 = vmov -1e+30  }
 0x11c   : > { %538 = vst.msk [vmem:[#allocation4] sm:$0xff] %vm537_vm1, %v2868_v41 }
 0x11d   : > { %1692 = vperm.xlu1 %2496, %v1566_v43   ;;  %v1610_v43 = vrot.slane %v1485_v40, %v3258_v36 }
 0x121   : > { %1696 = vperm.xlu1 %2496, %v1570_v45  }
 0x125   : > { %1700 = vperm.xlu1 %2496, %v1574_v47   ;;  %v1614_v47 = vrot.slane %v1499_v44, %v3258_v36 }
 0x1d5   : > { %v2274_v48 = vpop.f32.mrb[0].mxu0 }
 0x1d6   : > { %534 = vst.msk [vmem:[#allocation2 + $0x8] sm:$0xff] %vm532_vm0, %v2274_v48  ;;  %v513_v49 = vpop.f32.mrb[1].mxu0 }
 0x1d7   : > { %533 = vst.msk [vmem:[#allocation2] sm:$0xff] %vm532_vm0, %v513_v49  ;;  %v1507_v49 = vcombine.high %v1485_v40, %v1485_v40 }
 0x1d8   : > { %v2312_v53 = vpop.f32.mrb[0].mxu1 }
 0x1d9   : > { %v2277_v50 = vpop.f32.mrb[2].mxu0  ;;  %648 = vst.msk [vmem:[#allocation3 + $0x8] sm:$0xff] %vm532_vm0, %v2312_v53  ;;  %v627_v55 = vpop.f32.mrb[1].mxu1 }
 0x1da   : > { %536 = vst.msk [vmem:[#allocation2 + $0x18] sm:$0xff] %vm532_vm0, %v2277_v50  ;;  %v523_v51 = vpop.f32.mrb[3].mxu0  ;;  %647 = vst.msk [vmem:[#allocation3] sm:$0xff] %vm532_vm0, %v627_v55  ;;  %v1462_v50 = vcombine.high %v662_v33, %v662_v33  ;;  %v3378_v53 = vpop.permute.xlu1 %1640  ;;  %v1618_v55 = vrot.slane %v1507_v49, %v3258_v36 }
 0x1db   : > { %535 = vst.msk [vmem:[#allocation2 + $0x10] sm:$0xff] %vm532_vm0, %v523_v51 }
 0x1dc   : > { %v2315_v30 = vpop.f32.mrb[2].mxu1  ;;  %v1476_v59 = vrot.slane %v1462_v50, %v3251_v27 }
 0x1dd   : > { %v652_v54 = vld [vmem:[#allocation2 + $0x8] sm:$0xff]  ;;  %650 = vst.msk [vmem:[#allocation3 + $0x18] sm:$0xff] %vm532_vm0, %v2315_v30  ;;  %v637_v46 = vpop.f32.mrb[3].mxu1 }
 0x1de   : > { %v722_v56 = vrot.slane %v652_v54, %v3258_v36  ;;  %v3311_v57 = vld [vmem:[#allocation2] sm:$0xff]  ;;  %v729_v63 = vrot.slane %v652_v54, %v3314_v58  ;;  %v736_v4 = vrot.slane %v652_v54, %v3306_v52  ;;  %v743_v9 = vrot.slane %v652_v54, %v3320_v61  ;;  %649 = vst.msk [vmem:[#allocation3 + $0x10] sm:$0xff] %vm532_vm0, %v637_v46  ;;  %v3385_v62 = vpop.permute.xlu1 %1648 }
 0x1df   : > { %v680_v60 = vrot.slane %v3311_v57, %v3306_v52  ;;  %v687_v0 = vrot.slane %v3311_v57, %v3320_v61  ;;  %v701_v5 = vrot.slane %v3311_v57, %v3327_v1  ;;  %v750_v15 = vrot.slane %v652_v54, %v3337_v10 }
 0x1e0   : > { %724 = vbcast.lane.b32.xlu0 %v722_v56, 256  ;;  %v757_v19 = vrot.slane %v652_v54, %v3327_v1  ;;  %v764_v24 = vrot.slane %v652_v54, %v3345_v20  ;;  %v771_v29 = vrot.slane %v652_v54, %v3351_v25  ;;  %v666_v14 = vrot.slane %v3311_v57, %v3258_v36 }
 0x1e1   : > { %682 = vbcast.lane.b32.xlu1 %v680_v60, 256  ;;  %v673_v38 = vrot.slane %v3311_v57, %v3314_v58  ;;  %v694_v42 = vrot.slane %v3311_v57, %v3337_v10  ;;  %v708_v45 = vrot.slane %v3311_v57, %v3345_v20  ;;  %v3374_v48 = vld [vmem:[#allocation2 + $0x18] sm:$0xff]  ;;  %v715_v51 = vrot.slane %v3311_v57, %v3351_v25  ;;  %v655_v40 = vld [vmem:[#allocation3] sm:$0xff] }
 0x1e2   : > { %v834_v54 = vrot.slane %v3374_v48, %v3258_v36  ;;  %v1509_v56 = vcombine.high %v1499_v44, %v1499_v44  ;;  %v1492_v57 = vrot.slane %v1476_v59, %v3251_v27  ;;  %v848_v3 = vrot.slane %v3374_v48, %v3306_v52  ;;  %v653_v8 = vld [vmem:[#allocation2 + $0x10] sm:$0xff] }
 0x1e3   : > { %v785_v12 = vrot.slane %v653_v8, %v3314_v58  ;;  %v799_v17 = vrot.slane %v653_v8, %v3320_v61  ;;  %v806_v18 = vrot.slane %v653_v8, %v3337_v10  ;;  %v820_v22 = vrot.slane %v653_v8, %v3345_v20 }
 0x1e4   : > { %731 = vbcast.lane.b32.xlu0 %v729_v63, 256  ;;  %v1622_v60 = vrot.slane %v1509_v56, %v3258_v36  ;;  %v841_v63 = vrot.slane %v3374_v48, %v3314_v58  ;;  %v1508_v2 = vcombine.high %v1492_v57, %v1492_v57  ;;  %v1478_v28 = vcombine.high %v1476_v59, %v1476_v59 }
 0x1e5   : > { %689 = vbcast.lane.b32.xlu1 %v687_v0, 256  ;;  %v1626_v0 = vrot.slane %v1492_v57, %v3258_v36  ;;  %v891_v46 = vcombine.high %v655_v40, %v655_v40  ;;  %v656_v57 = vld [vmem:[#allocation3 + $0x8] sm:$0xff] }
 0x1e6   : > { %v1506_v32 = vrot.slane %v1478_v28, %v3251_v27 }
 0x1e7   : > { %v905_v50 = vrot.slane %v891_v46, %v3251_v27 }
 0x1e8   : > { %738 = vbcast.lane.b32.xlu0 %v736_v4, 256  ;;  %v3393_v4 = vpop.permute.xlu1 %1656  ;;  %v1510_v33 = vcombine.high %v1506_v32, %v1506_v32 }
 0x1e9   : > { %703 = vbcast.lane.b32.xlu1 %v701_v5, 256  ;;  %v1634_v5 = vrot.slane %v1508_v2, %v3258_v36  ;;  %v907_v59 = vcombine.high %v905_v50, %v905_v50 }
 0x1ec   : > { %745 = vbcast.lane.b32.xlu0 %v743_v9, 256  ;;  %v3398_v9 = vpop.permute.xlu1 %1652 }
 0x1ed   : > { %1704 = vperm.xlu1 %2496, %v1578_v7   ;;  %v855_v7 = vrot.slane %v3374_v48, %v3320_v61  ;;  %v862_v61 = vrot.slane %v3374_v48, %v3337_v10  ;;  %v883_v10 = vrot.slane %v3374_v48, %v3351_v25 }
 0x1f0   : > { %752 = vbcast.lane.b32.xlu0 %v750_v15, 256  ;;  %v3402_v13 = vpop.permute.xlu1 %1660  ;;  %v792_v15 = vrot.slane %v653_v8, %v3306_v52  ;;  %v827_v52 = vrot.slane %v653_v8, %v3351_v25 }
 0x1f1   : > { %1708 = vperm.xlu1 %2496, %v1582_v11   ;;  %v778_v11 = vrot.slane %v653_v8, %v3258_v36 }
 0x1f4   : > { %759 = vbcast.lane.b32.xlu0 %v757_v19, 256 }
 0x1f5   : > { %1712 = vperm.xlu1 %2496, %v1586_v16   ;;  %v3405_v16 = vpop.permute.xlu1 %1664 }
 0x1f8   : > { %766 = vbcast.lane.b32.xlu0 %v764_v24, 256 }
 0x1f9   : > { %1716 = vperm.xlu1 %2496, %v1590_v21   ;;  %v3409_v19 = vpop.permute.xlu1 %1668  ;;  %v813_v21 = vrot.slane %v653_v8, %v3327_v1 }
 0x1fc   : > { %773 = vbcast.lane.b32.xlu0 %v771_v29, 256  ;;  %v876_v29 = vrot.slane %v3374_v48, %v3345_v20  ;;  %v1638_v20 = vrot.slane %v1510_v33, %v3258_v36 }
 0x1fd   : > { %1720 = vperm.xlu1 %2496, %v1594_v26   ;;  %v3412_v58 = vpop.permute.xlu1 %1672  ;;  %v869_v26 = vrot.slane %v3374_v48, %v3327_v1 }
 0x200   : > { %668 = vbcast.lane.b32.xlu0 %v666_v14, 256  ;;  %v1630_v14 = vrot.slane %v1506_v32, %v3258_v36 }
 0x201   : > { %1724 = vperm.xlu1 %2496, %v1598_v31   ;;  %v3416_v23 = vpop.permute.xlu1 %1676  ;;  %v3428_v31 = vpop.permute.xlu0 %1644 }
 0x204   : > { %675 = vbcast.lane.b32.xlu0 %v673_v38, 256 }
 0x205   : > { %1728 = vperm.xlu1 %2496, %v1602_v34   ;;  %v3420_v24 = vpop.permute.xlu1 %1680 }
 0x208   : > { %696 = vbcast.lane.b32.xlu0 %v694_v42, 256  ;;  %v898_v42 = vrot.slane %v655_v40, %v3251_v27 }
 0x209   : > { %1732 = vperm.xlu1 %2496, %v1606_v39   ;;  %v3426_v30 = vpop.permute.xlu1 %1684 }
 0x20a   : > { %v914_v48 = vrot.slane %v898_v42, %v3251_v27 }
 0x20c   : > { %710 = vbcast.lane.b32.xlu0 %v708_v45, 256  ;;  %v906_v45 = vcombine.high %v898_v42, %v898_v42  ;;  %v1090_v2 = vrot.slane %v914_v48, %v3258_v36 }
 0x20d   : > { %1736 = vperm.xlu1 %2496, %v1610_v43   ;;  %v3434_v1 = vpop.permute.xlu1 %1688 }
 0x20e   : > { %v928_v49 = vrot.slane %v906_v45, %v3251_v27 }
 0x210   : > { %717 = vbcast.lane.b32.xlu0 %v715_v51, 256  ;;  %v938_v56 = vcombine.high %v928_v49, %v928_v49 }
 0x211   : > { %1740 = vperm.xlu1 %2496, %v1614_v47   ;;  %v3441_v37 = vpop.permute.xlu1 %1692 }
 0x214   : > { %836 = vbcast.lane.b32.xlu0 %v834_v54, 256 }
 0x215   : > { %1744 = vperm.xlu1 %2496, %v1618_v55   ;;  %v3445_v39 = vpop.permute.xlu1 %1696  ;;  %v936_v55 = vcombine.high %v914_v48, %v914_v48 }
 0x218   : > { %843 = vbcast.lane.b32.xlu0 %v841_v63, 256  ;;  %v1098_v63 = vrot.slane %v936_v55, %v3258_v36 }
 0x219   : > { %1748 = vperm.xlu1 %2496, %v1622_v60   ;;  %v3453_v44 = vpop.permute.xlu1 %1700 }
 0x21c   : > { %850 = vbcast.lane.b32.xlu0 %v848_v3, 256  ;;  %v1102_v3 = vrot.slane %v938_v56, %v3258_v36 }
 0x21d   : > { %1752 = vperm.xlu1 %2496, %v1626_v0  }
 0x220   : > { %857 = vbcast.lane.b32.xlu0 %v855_v7, 256  ;;  %v947_v7 = vrot.slane %v656_v57, %v3251_v27 }
 0x221   : > { %1760 = vperm.xlu1 %2496, %v1634_v5   ;;  %v935_v5 = vrot.slane %v907_v59, %v3251_v27 }
 0x223   : > { %v939_v42 = vcombine.high %v935_v5, %v935_v5 }
 0x224   : > { %780 = vbcast.lane.b32.xlu0 %v778_v11, 256 }
 0x228   : > { %787 = vbcast.lane.b32.xlu0 %v785_v12, 256 }
 0x22c   : > { %794 = vbcast.lane.b32.xlu0 %v792_v15, 256  ;;  %v1094_v15 = vrot.slane %v928_v49, %v3258_v36 }
 0x230   : > { %801 = vbcast.lane.b32.xlu0 %v799_v17, 256  ;;  %v921_v17 = vrot.slane %v905_v50, %v3251_v27 }
 0x232   : > { %v937_v32 = vcombine.high %v921_v17, %v921_v17 }
 0x234   : > { %808 = vbcast.lane.b32.xlu0 %v806_v18, 256  ;;  %v955_v18 = vcombine.high %v947_v7, %v947_v7  ;;  %v1114_v41 = vrot.slane %v937_v32, %v3258_v36 }
 0x238   : > { %815 = vbcast.lane.b32.xlu0 %v813_v21, 256 }
 0x23c   : > { %822 = vbcast.lane.b32.xlu0 %v820_v22, 256  ;;  %v1110_v22 = vrot.slane %v935_v5, %v3258_v36 }
 0x240   : > { %829 = vbcast.lane.b32.xlu0 %v827_v52, 256 }
 0x244   : > { %864 = vbcast.lane.b32.xlu0 %v862_v61, 256  ;;  %v963_v61 = vrot.slane %v947_v7, %v3251_v27 }
 0x246   : > { %v985_v59 = vcombine.high %v963_v61, %v963_v61 }
 0x248   : > { %871 = vbcast.lane.b32.xlu0 %v869_v26, 256 }
 0x24c   : > { %878 = vbcast.lane.b32.xlu0 %v876_v29, 256  ;;  %v1106_v29 = vrot.slane %v921_v17, %v3258_v36 }
 0x250   : > { %885 = vbcast.lane.b32.xlu0 %v883_v10, 256  ;;  %v977_v10 = vrot.slane %v955_v18, %v3251_v27 }
 0x252   : > { %v3436_v34 = vpop.permute.xlu0 %724  ;;  %v1126_v45 = vrot.slane %v977_v10, %v3258_v36 }
 0x253   : > { %v683_v51 = vpop.permute.xlu1 %682 }
 0x254   : > { %1756 = vperm.xlu0 %2497, %v1630_v14   ;;  %v1249_v11 = vadd.f32 %v1098_v63, %v683_v51  ;;  %v1118_v51 = vrot.slane %v939_v42, %v3258_v36  ;;  %v940_v63 = vcombine.high %v656_v57, %v656_v57 }
 0x256   : > { %v3439_v35 = vpop.permute.xlu0 %731 }
 0x257   : > { %v690_v0 = vpop.permute.xlu1 %689  ;;  %v1256_v55 = vadd.f32 %v1126_v45, %v3439_v35  ;;  %v954_v35 = vrot.slane %v940_v63, %v3251_v27 }
 0x258   : > { %1764 = vperm.xlu0 %2497, %v1638_v20   ;;  %v1250_v21 = vadd.f32 %v1102_v3, %v690_v0  ;;  %v1122_v20 = vrot.slane %v963_v61, %v3258_v36 }
 0x25a   : > { %v3443_v38 = vpop.permute.xlu0 %738  ;;  %v1255_v49 = vadd.f32 %v1122_v20, %v3436_v34 }
 0x25b   : > { %v704_v52 = vpop.permute.xlu1 %703 }
 0x25c   : > { %v1252_v14 = vadd.f32 %v1110_v22, %v704_v52  ;;  %v956_v52 = vcombine.high %v954_v35, %v954_v35 }
 0x25e   : > { %v3447_v25 = vpop.permute.xlu0 %745 }
 0x262   : > { %v3451_v43 = vpop.permute.xlu0 %752 }
 0x266   : > { %v3455_v47 = vpop.permute.xlu0 %759 }
 0x26a   : > { %v3460_v54 = vpop.permute.xlu0 %766 }
 0x26e   : > { %v3462_v60 = vpop.permute.xlu0 %773 }
 0x272   : > { %v669_v8 = vpop.permute.xlu0 %668 }
 0x273   : > { %v1247_v12 = vadd.f32 %v1090_v2, %v669_v8 }
 0x275   : > { %2505 = vtanh.f32 %v1247_v12  ;;  %v987_v12 = vcombine.high %v977_v10, %v977_v10 }
 0x276   : > { %v676_v26 = vpop.permute.xlu0 %675  ;;  %2507 = vtanh.f32 %v1249_v11  ;;  %v1130_v11 = vrot.slane %v985_v59, %v3258_v36 }
 0x277   : > { %v1248_v28 = vadd.f32 %v1094_v15, %v676_v26  ;;  %2509 = vtanh.f32 %v1250_v21  ;;  %v3486_v15 = vpop.permute.xlu1 %1704 }
 0x278   : > { %v1257_v26 = vadd.f32 %v1130_v11, %v3443_v38 }
 0x279   : > { %2511 = vtanh.f32 %v1248_v28  ;;  %v1134_v28 = vrot.slane %v987_v12, %v3258_v36 }
 0x27a   : > { %v697_v33 = vpop.permute.xlu0 %696  ;;  %2513 = vtanh.f32 %v1252_v14 }
 0x27b   : > { %v1251_v40 = vadd.f32 %v1106_v29, %v697_v33  ;;  %v970_v29 = vrot.slane %v954_v35, %v3251_v27  ;;  %v3502_v20 = vpop.permute.xlu1 %1708  ;;  %v1258_v45 = vadd.f32 %v1134_v28, %v3447_v25 }
 0x27d   : > { %2515 = vtanh.f32 %v1251_v40 }
 0x27e   : > { %v711_v46 = vpop.permute.xlu0 %710 }
 0x27f   : > { %v2506_v48 = vpop.eup %2505  ;;  %v1253_v50 = vadd.f32 %v1114_v41, %v711_v46  ;;  %v984_v41 = vrot.slane %v956_v52, %v3251_v27  ;;  %v1138_v46 = vrot.slane %v970_v29, %v3258_v36 }
 0x280   : > { %v2508_v56 = vpop.eup %2507  ;;  %v1767_v2 = vmul.f32 %v2506_v48, %v3378_v53 }
 0x281   : > { %2517 = vtanh.f32 %v1253_v50  ;;  %v2510_v0 = vpop.eup %2509  ;;  %v1769_v8 = vmul.f32 %v2508_v56, %v3385_v62  ;;  %v986_v56 = vcombine.high %v970_v29, %v970_v29 }
 0x282   : > { %v718_v3 = vpop.permute.xlu0 %717  ;;  %2519 = vtanh.f32 %v1255_v49  ;;  %v1770_v53 = vmul.f32 %v2510_v0, %v3398_v9  ;;  %v1799_v17 = vsel %vm532_vm0, %v1767_v2, 0.0  ;;  %v1259_v2 = vadd.f32 %v1138_v46, %v3451_v43 }
 0x283   : > { %v2512_v5 = vpop.eup %2511  ;;  %v1254_v7 = vadd.f32 %v1118_v51, %v718_v3  ;;  %2521 = vtanh.f32 %v1256_v55  ;;  %v657_v51 = vld [vmem:[#allocation3 + $0x10] sm:$0xff]  ;;  %v3517_v3 = vpop.permute.xlu1 %1712 }
 0x284   : > { %v1768_v34 = vmul.f32 %v2512_v5, %v3428_v31  ;;  %v2514_v57 = vpop.eup %2513  ;;  %v1802_v31 = vsel %vm532_vm0, %v1769_v8, 0.0  ;;  %v1804_v32 = vsel %vm532_vm0, %v1770_v53, 0.0 }
 0x285   : > { %2523 = vtanh.f32 %v1254_v7  ;;  %v1772_v10 = vmul.f32 %v2514_v57, %v3402_v13  ;;  %v996_v7 = vrot.slane %v657_v51, %v3251_v27  ;;  %v988_v57 = vcombine.high %v984_v41, %v984_v41 }
 0x286   : > { %v1800_v18 = vsel %vm532_vm0, %v1768_v34, 0.0  ;;  %v3491_v21 = vpop.permute.xlu0 %836  ;;  %2525 = vtanh.f32 %v1257_v26 }
 0x287   : > { %v2516_v62 = vpop.eup %2515  ;;  %v1801_v22 = vadd.f32 %v1800_v18, %v1799_v17  ;;  %v1808_v49 = vsel %vm532_vm0, %v1772_v10, 0.0  ;;  %2527 = vtanh.f32 %v1258_v45  ;;  %v1004_v12 = vcombine.high %v996_v7, %v996_v7 }
 0x288   : > { %v1771_v61 = vmul.f32 %v2516_v62, %v3393_v4  ;;  %2529 = vtanh.f32 %v1259_v2  ;;  %v1012_v17 = vrot.slane %v996_v7, %v3251_v27  ;;  %v1150_v26 = vrot.slane %v988_v57, %v3258_v36 }
 0x289   : > { %v1803_v9 = vadd.f32 %v1802_v31, %v1801_v22  ;;  %v3529_v22 = vpop.permute.xlu1 %1716  ;;  %v1026_v52 = vrot.slane %v1004_v12, %v3251_v27 }
 0x28a   : > { %v3500_v14 = vpop.permute.xlu0 %843  ;;  %v1806_v4 = vsel %vm532_vm0, %v1771_v61, 0.0  ;;  %v989_v61 = vcombine.high %v657_v51, %v657_v51  ;;  %v1034_v29 = vcombine.high %v1012_v17, %v1012_v17 }
 0x28b   : > { %v2518_v33 = vpop.eup %2517  ;;  %v1805_v40 = vadd.f32 %v1804_v32, %v1803_v9 }
 0x28c   : > { %v1773_v38 = vmul.f32 %v2518_v33, %v3405_v16  ;;  %v2520_v42 = vpop.eup %2519  ;;  %v1142_v16 = vrot.slane %v984_v41, %v3258_v36  ;;  %v1158_v33 = vrot.slane %v1026_v52, %v3258_v36  ;;  %v1003_v41 = vrot.slane %v989_v61, %v3251_v27 }
 0x28d   : > { %v1807_v48 = vadd.f32 %v1806_v4, %v1805_v40  ;;  %v2522_v13 = vpop.eup %2521  ;;  %v1775_v63 = vmul.f32 %v2520_v42, %v3412_v58  ;;  %v1036_v40 = vcombine.high %v1026_v52, %v1026_v52  ;;  %v1262_v4 = vadd.f32 %v1150_v26, %v3462_v60 }
 0x28e   : > { %v3510_v50 = vpop.permute.xlu0 %850  ;;  %v1810_v0 = vsel %vm532_vm0, %v1773_v38, 0.0  ;;  %v1776_v8 = vmul.f32 %v2522_v13, %v3416_v23  ;;  %v1260_v43 = vadd.f32 %v1142_v16, %v3455_v47  ;;  %v1154_v47 = vrot.slane %v1012_v17, %v3258_v36  ;;  %v3539_v38 = vpop.permute.xlu1 %1720 }
 0x28f   : > { %v2524_v55 = vpop.eup %2523  ;;  %v1809_v59 = vadd.f32 %v1808_v49, %v1807_v48  ;;  %v1814_v35 = vsel %vm532_vm0, %v1775_v63, 0.0  ;;  %v1005_v13 = vcombine.high %v1003_v41, %v1003_v41  ;;  %v1019_v60 = vrot.slane %v1003_v41, %v3251_v27 }
 0x290   : > { %v1774_v25 = vmul.f32 %v2524_v55, %v3409_v19  ;;  %v1146_v19 = vrot.slane %v986_v56, %v3258_v36  ;;  %v1816_v18 = vsel %vm532_vm0, %v1776_v8, 0.0  ;;  %v2526_v62 = vpop.eup %2525  ;;  %2531 = vtanh.f32 %v1260_v43 }
 0x291   : > { %v1811_v5 = vadd.f32 %v1810_v0, %v1809_v59  ;;  %v1777_v9 = vmul.f32 %v2526_v62, %v3420_v24  ;;  %v2528_v10 = vpop.eup %2527  ;;  %v3544_v24 = vld [vmem:[#allocation3 + $0x18] sm:$0xff]  ;;  %v1166_v56 = vrot.slane %v1036_v40, %v3258_v36 }
 0x292   : > { %v1812_v34 = vsel %vm532_vm0, %v1774_v25, 0.0  ;;  %v3522_v11 = vpop.permute.xlu0 %857  ;;  %v1261_v28 = vadd.f32 %v1146_v19, %v3460_v54  ;;  %v1162_v54 = vrot.slane %v1034_v29, %v3258_v36  ;;  %v1778_v46 = vmul.f32 %v2528_v10, %v3426_v30  ;;  %v2530_v49 = vpop.eup %2529 }
 0x293   : > { %v1813_v58 = vadd.f32 %v1812_v34, %v1811_v5  ;;  %v1818_v45 = vsel %vm532_vm0, %v1777_v9, 0.0  ;;  %v1045_v59 = vrot.slane %v3544_v24, %v3251_v27  ;;  %v1779_v30 = vmul.f32 %v2530_v49, %v3434_v1  ;;  %v3553_v5 = vpop.permute.xlu1 %1724 }
 0x294   : > { %2533 = vtanh.f32 %v1261_v28  ;;  %v1820_v16 = vsel %vm532_vm0, %v1778_v46, 0.0  ;;  %v1033_v25 = vrot.slane %v1005_v13, %v3251_v27  ;;  %v1170_v34 = vrot.slane %v1019_v60, %v3258_v36 }
 0x295   : > { %v1815_v53 = vadd.f32 %v1814_v35, %v1813_v58  ;;  %2535 = vtanh.f32 %v1262_v4  ;;  %v1061_v58 = vrot.slane %v1045_v59, %v3251_v27  ;;  %v1822_v12 = vsel %vm532_vm0, %v1779_v30, 0.0 }
 0x296   : > { %v781_v23 = vpop.permute.xlu0 %780  ;;  %v1053_v19 = vcombine.high %v1045_v59, %v1045_v59  ;;  %v1174_v57 = vrot.slane %v1033_v25, %v3258_v36 }
 0x297   : > { %v1817_v31 = vadd.f32 %v1816_v18, %v1815_v53  ;;  %v1263_v42 = vadd.f32 %v1154_v47, %v781_v23  ;;  %v1035_v18 = vcombine.high %v1019_v60, %v1019_v60  ;;  %v3560_v23 = vpop.permute.xlu1 %1728  ;;  %v1186_v61 = vrot.slane %v1061_v58, %v3258_v36 }
 0x299   : > { %v1819_v51 = vadd.f32 %v1818_v45, %v1817_v31  ;;  %2537 = vtanh.f32 %v1263_v42  ;;  %v1178_v9 = vrot.slane %v1035_v18, %v3258_v36  ;;  %v1271_v45 = vadd.f32 %v1186_v61, %v3491_v21 }
 0x29a   : > { %v788_v32 = vpop.permute.xlu0 %787  ;;  %v2532_v2 = vpop.eup %2531 }
 0x29b   : > { %v1264_v55 = vadd.f32 %v1158_v33, %v788_v32  ;;  %v1821_v7 = vadd.f32 %v1820_v16, %v1819_v51  ;;  %v1780_v35 = vmul.f32 %v2532_v2, %v3441_v37  ;;  %v1075_v37 = vrot.slane %v1053_v19, %v3251_v27  ;;  %v1733_v46 = vpop.permute.xlu1 %1732 }
 0x29c   : > { %v1037_v32 = vcombine.high %v1033_v25, %v1033_v25  ;;  %v1083_v33 = vcombine.high %v1061_v58, %v1061_v58 }
 0x29d   : > { %2539 = vtanh.f32 %v1264_v55  ;;  %v1823_v53 = vadd.f32 %v1822_v12, %v1821_v7  ;;  %v1824_v31 = vsel %vm532_vm0, %v1780_v35, 0.0  ;;  %v1085_v60 = vcombine.high %v1075_v37, %v1075_v37 }
 0x29e   : > { %v795_v48 = vpop.permute.xlu0 %794  ;;  %v2534_v43 = vpop.eup %2533  ;;  %v1182_v49 = vrot.slane %v1037_v32, %v3258_v36 }
 0x29f   : > { %v1265_v63 = vadd.f32 %v1162_v54, %v795_v48  ;;  %v2536_v62 = vpop.eup %2535  ;;  %v1781_v52 = vmul.f32 %v2534_v43, %v3445_v39  ;;  %v1825_v47 = vadd.f32 %v1824_v31, %v1823_v53  ;;  %v1190_v39 = vrot.slane %v1075_v37, %v3258_v36  ;;  %v1737_v7 = vpop.permute.xlu1 %1736 }
 0x2a0   : > { %v1782_v41 = vmul.f32 %v2536_v62, %v3453_v44  ;;  %v1038_v44 = vcombine.high %v3544_v24, %v3544_v24  ;;  %v1198_v35 = vrot.slane %v1085_v60, %v3258_v36 }
 0x2a1   : > { %2541 = vtanh.f32 %v1265_v63  ;;  %v1826_v40 = vsel %vm532_vm0, %v1781_v52, 0.0  ;;  %v1272_v30 = vadd.f32 %v1190_v39, %v3500_v14 }
 0x2a2   : > { %v802_v0 = vpop.permute.xlu0 %801  ;;  %v1827_v48 = vadd.f32 %v1826_v40, %v1825_v47  ;;  %v1274_v31 = vadd.f32 %v1198_v35, %v3522_v11 }
 0x2a3   : > { %v1266_v8 = vadd.f32 %v1166_v56, %v802_v0  ;;  %v2538_v28 = vpop.eup %2537  ;;  %v1194_v56 = vrot.slane %v1083_v33, %v3258_v36  ;;  %v1741_v62 = vpop.permute.xlu1 %1740 }
 0x2a4   : > { %v1783_v4 = vmul.f32 %v2538_v28, %v3486_v15  ;;  %v1828_v15 = vsel %vm532_vm0, %v1782_v41, 0.0 }
 0x2a5   : > { %2543 = vtanh.f32 %v1266_v8  ;;  %v1052_v8 = vrot.slane %v1038_v44, %v3251_v27  ;;  %v1273_v14 = vadd.f32 %v1194_v56, %v3510_v50 }
 0x2a6   : > { %v809_v1 = vpop.permute.xlu0 %808  ;;  %v1830_v59 = vsel %vm532_vm0, %v1783_v4, 0.0 }
 0x2a7   : > { %v1267_v17 = vadd.f32 %v1170_v34, %v809_v1  ;;  %v2540_v10 = vpop.eup %2539  ;;  %v1068_v43 = vrot.slane %v1052_v8, %v3251_v27  ;;  %v1745_v39 = vpop.permute.xlu1 %1744 }
 0x2a8   : > { %v1784_v51 = vmul.f32 %v2540_v10, %v3502_v20  ;;  %v1829_v20 = vadd.f32 %v1828_v15, %v1827_v48 }
 0x2a9   : > { %2545 = vtanh.f32 %v1267_v17  ;;  %v1054_v17 = vcombine.high %v1052_v8, %v1052_v8  ;;  %v1084_v28 = vcombine.high %v1068_v43, %v1068_v43 }
 0x2aa   : > { %v816_v26 = vpop.permute.xlu0 %815  ;;  %v1832_v25 = vsel %vm532_vm0, %v1784_v51, 0.0  ;;  %v1831_v24 = vadd.f32 %v1830_v59, %v1829_v20 }
 0x2ab   : > { %v1268_v29 = vadd.f32 %v1174_v57, %v816_v26  ;;  %v2542_v54 = vpop.eup %2541  ;;  %v1749_v44 = vpop.permute.xlu1 %1748 }
 0x2ac   : > { %v1785_v21 = vmul.f32 %v2542_v54, %v3517_v3  ;;  %v1833_v19 = vadd.f32 %v1832_v25, %v1831_v24 }
 0x2ad   : > { %2547 = vtanh.f32 %v1268_v29  ;;  %v1082_v29 = vrot.slane %v1054_v17, %v3251_v27  ;;  %v1868_v17 = vstv %s1862_s27 }
 0x2ae   : > { %v823_v42 = vpop.permute.xlu0 %822  ;;  %v1834_v34 = vsel %vm532_vm0, %v1785_v21, 0.0 }
 0x2af   : > { %v1269_v13 = vadd.f32 %v1178_v9, %v823_v42  ;;  %v2544_v55 = vpop.eup %2543  ;;  %v1835_v57 = vadd.f32 %v1834_v34, %v1833_v19  ;;  %v1206_v54 = vrot.slane %v1082_v29, %v3258_v36  ;;  %v1086_v27 = vcombine.high %v1082_v29, %v1082_v29  ;;  %v1753_v25 = vpop.permute.xlu1 %1752  ;;  %v1902_v29 = vld [vmem:[%s3227_s14] sm:$0xff] }
 0x2b0   : > { %v1786_v2 = vmul.f32 %v2544_v55, %v3529_v22 }
 0x2b1   : > { %2549 = vtanh.f32 %v1269_v13  ;;  %v1214_v15 = vrot.slane %v1086_v27, %v3258_v36 }
 0x2b2   : > { %v830_v63 = vpop.permute.xlu0 %829  ;;  %2551 = vtanh.f32 %v1271_v45  ;;  %v1836_v1 = vsel %vm532_vm0, %v1786_v2, 0.0 }
 0x2b3   : > { %v2546_v16 = vpop.eup %2545  ;;  %v1270_v0 = vadd.f32 %v1182_v49, %v830_v63  ;;  %v1837_v50 = vadd.f32 %v1836_v1, %v1835_v57 }
 0x2b4   : > { %v1787_v3 = vmul.f32 %v2546_v16, %v3539_v38 }
 0x2b5   : > { %2553 = vtanh.f32 %v1270_v0 }
 0x2b6   : > { %v865_v58 = vpop.permute.xlu0 %864  ;;  %2555 = vtanh.f32 %v1272_v30  ;;  %v1838_v53 = vsel %vm532_vm0, %v1787_v3, 0.0  ;;  %v1761_v3 = vpop.permute.xlu1 %1760 }
 0x2b7   : > { %v2548_v12 = vpop.eup %2547  ;;  %2557 = vtanh.f32 %v1273_v14  ;;  %v1839_v26 = vadd.f32 %v1838_v53, %v1837_v50 }
 0x2b8   : > { %v1788_v22 = vmul.f32 %v2548_v12, %v3553_v5  ;;  %v1202_v5 = vrot.slane %v1068_v43, %v3258_v36  ;;  %2559 = vtanh.f32 %v1274_v31 }
 0x2ba   : > { %v872_v18 = vpop.permute.xlu0 %871  ;;  %v1840_v52 = vsel %vm532_vm0, %v1788_v22, 0.0  ;;  %v1275_v10 = vadd.f32 %v1202_v5, %v865_v58  ;;  %v1865_v22 = vand.u32 127, %v663_v6  ;;  %v1871_v6 = vld [vmem:[#allocation4] sm:$0xff] }
 0x2bb   : > { %v2550_v38 = vpop.eup %2549  ;;  %v1841_v32 = vadd.f32 %v1840_v52, %v1839_v26  ;;  %v1276_v55 = vadd.f32 %v1206_v54, %v872_v18 }
 0x2bc   : > { %v1789_v61 = vmul.f32 %v2550_v38, %v3560_v23  ;;  %v2552_v37 = vpop.eup %2551  ;;  %v1210_v23 = vrot.slane %v1084_v28, %v3258_v36  ;;  %2561 = vtanh.f32 %v1275_v10  ;;  %vm1869_vm2 = vcmp.lt.s32.totalorder %v1865_v22, %v1868_v17 }
 0x2bd   : > { %v1791_v33 = vmul.f32 %v2552_v37, %v1737_v7  ;;  %v2869_v37 = vmov 0.0  }
 0x2be   : > { %v1842_v47 = vsel %vm532_vm0, %v1789_v61, 0.0  ;;  %v879_v40 = vpop.permute.xlu0 %878  ;;  %539 = vst.msk [vmem:[#allocation5] sm:$0xff] %vm537_vm1, %v2869_v37  ;;  %2316 = vmatprep.subr.mxu0 %v2869_v37  ;;  %2318 = vmatprep.mubr.msk.f32.mxu0 %vm2870_vm3, %v2869_v37 }
 0x2bf   : > { %v2554_v9 = vpop.eup %2553  ;;  %v1843_v4 = vadd.f32 %v1842_v47, %v1841_v32  ;;  %v1277_v48 = vadd.f32 %v1210_v23, %v879_v40  ;;  %v1846_v13 = vsel %vm532_vm0, %v1791_v33, 0.0  ;;  %2317 = vmatpush3.msra.mxu0 %v1902_v29 }
 0x2c0   : > { %v1790_v11 = vmul.f32 %v2554_v9, %v1733_v46  ;;  %v2556_v41 = vpop.eup %2555 }
 0x2c1   : > { %v1792_v49 = vmul.f32 %v2556_v41, %v1741_v62  ;;  %v2558_v51 = vpop.eup %2557  ;;  %2563 = vtanh.f32 %v1277_v48 }
 0x2c2   : > { %v1844_v42 = vsel %vm532_vm0, %v1790_v11, 0.0  ;;  %v886_v56 = vpop.permute.xlu0 %885  ;;  %v1793_v59 = vmul.f32 %v2558_v51, %v1745_v39  ;;  %v2560_v21 = vpop.eup %2559  ;;  %2565 = vtanh.f32 %v1276_v55 }
 0x2c3   : > { %v1845_v45 = vadd.f32 %v1844_v42, %v1843_v4  ;;  %v1848_v60 = vsel %vm532_vm0, %v1792_v49, 0.0  ;;  %v1278_v63 = vadd.f32 %v1214_v15, %v886_v56  ;;  %v1794_v20 = vmul.f32 %v2560_v21, %v1749_v44 }
 0x2c4   : > { %v1850_v30 = vsel %vm532_vm0, %v1793_v59, 0.0 }
 0x2c5   : > { %v1847_v46 = vadd.f32 %v1846_v13, %v1845_v45  ;;  %2567 = vtanh.f32 %v1278_v63  ;;  %v1852_v7 = vsel %vm532_vm0, %v1794_v20, 0.0  ;;  %v1887_v41 = vld [vmem:[#allocation5] sm:$0xff] }
 0x2c6   : > { %v2562_v0 = vpop.eup %2561 }
 0x2c7   : > { %v1849_v16 = vadd.f32 %v1848_v60, %v1847_v46  ;;  %v1795_v24 = vmul.f32 %v2562_v0, %v1753_v25 }
 0x2c9   : > { %v1851_v2 = vadd.f32 %v1850_v30, %v1849_v16  ;;  %v1854_v12 = vsel %vm532_vm0, %v1795_v24, 0.0 }
 0x2cb   : > { %v2564_v8 = vpop.eup %2563  ;;  %v1853_v36 = vadd.f32 %v1852_v7, %v1851_v2 }
 0x2cc   : > { %v2566_v34 = vpop.eup %2565  ;;  %v1797_v35 = vmul.f32 %v2564_v8, %v1761_v3 }
 0x2cd   : > { %v1855_v19 = vadd.f32 %v1854_v12, %v1853_v36 }
 0x2ce   : > { %v1858_v38 = vsel %vm532_vm0, %v1797_v35, 0.0 }
 0x2cf   : > { %v2568_v57 = vpop.eup %2567 }
 0x2d3   : > { %v1757_v58 = vpop.permute.xlu0 %1756 }
 0x2d4   : > { %v1796_v14 = vmul.f32 %v2566_v34, %v1757_v58 }
 0x2d6   : > { %v1856_v1 = vsel %vm532_vm0, %v1796_v14, 0.0 }
 0x2d7   : > { %v1857_v43 = vadd.f32 %v1856_v1, %v1855_v19  ;;  %v1765_v53 = vpop.permute.xlu0 %1764 }
 0x2d8   : > { %v1798_v18 = vmul.f32 %v2568_v57, %v1765_v53 }
 0x2d9   : > { %v1859_v62 = vadd.f32 %v1858_v38, %v1857_v43 }
 0x2da   : > { %v1860_v31 = vsel %vm532_vm0, %v1798_v18, 0.0 }
 0x2db   : > { %v1861_v50 = vadd.f32 %v1860_v31, %v1859_v62 }
 0x2dd   : > { %v1870_v52 = vsel %vm1869_vm2, %v1861_v50, -1000000.0 }
 0x2de   : > { %v1872_v61 = vsel %vm532_vm0, %v1870_v52, -inf }
 0x2df   : > { %1873 = vmax.xlane.f32.xlu1 %v1872_v61 }
 0x36c   : > { %v1874_v26 = vpop.xlane.xlu1 %1873 }
 0x36d   : > { %v1875_v5 = vmax.f32 %v1871_v6, %v1874_v26 }
 0x36f   : > { %v1876_v28 = vsub.f32 %v1871_v6, %v1875_v5  ;;  %1978 = vst.msk [vmem:[#allocation4] sm:$0xff] %vm537_vm1, %v1875_v5  ;;  %1881 = vperm.xlu0 %2497, %v1875_v5  }
 0x371   : > { %v1877_v47 = vmul.f32 1.442695, %v1876_v28 }
 0x373   : > { %2569 = vpow2.f32 %v1877_v47 }
 0x37d   : > { %v2570_v9 = vpop.eup %2569 }
 0x37e   : > { %1898 = vperm.xlu1 %2496, %v2570_v9   ;;  %v1888_v39 = vmul.f32 %v2570_v9, %v1887_v41 }
 0x3ee   : > { %v1882_v32 = vpop.permute.xlu0 %1881 }
 0x3ef   : > { %v1884_v10 = vsub.f32 %v1870_v52, %v1882_v32 }
 0x3f1   : > { %v1885_v33 = vmul.f32 1.442695, %v1884_v10 }
 0x3f3   : > { %2571 = vpow2.f32 %v1885_v33 }
 0x3fd   : > { %v2572_v11 = vpop.eup %2571  ;;  %v1899_v27 = vpop.permute.xlu1 %1898 }
 0x3fe   : > { %2319 = vmatmul.mubr.msk.f32.vlgmr.msra.gmra.mrb[4].mxu0 %vm532_vm0, %v2572_v11  ;;  %v1889_v40 = vsel %vm532_vm0, %v2572_v11, 0.0  ;;  %v1901_v13 = vmul.f32 0.0, %v1899_v27 }
 0x3ff   : > { %1890 = vadd.xlane.f32.xlu0 %v1889_v40 }
 0x48c   : > { %v1891_v4 = vpop.xlane.xlu0 %1890 }
 0x48d   : > { %v1892_v23 = vadd.f32 %v1891_v4, %v1888_v39 }
 0x48f   : > { %1894 = vst.msk [vmem:[#allocation5] sm:$0xff] %vm537_vm1, %v1892_v23 }
 0x496   : > { %v1982_v42 = vld [vmem:[#allocation5] sm:$0xff] }
 0x497   : > { %2573 = vrcp.f32 %v1982_v42 }
 0x4a1   : > { %v2574_v54 = vpop.eup %2573 }
 0x4a2   : > { %1987 = vperm.xlu0 %2497, %v2574_v54  }
 0x4d1   : > { %v1972_v45 = vpop.f32.mrb[4].mxu0 }
 0x4d2   : > { %v2320_v48 = vpop.f32.mrb[5].mxu0  ;;  %v1976_v49 = vadd.f32 %v1972_v45, %v1901_v13 }
 0x521   : > { %v1988_v51 = vpop.permute.xlu0 %1987 }
 0x522   : > { %v1990_v55 = vmul.f32 %v1988_v51, %v1976_v49 }
 0x524   : > { %1991 = vst [vmem:[%s422_s28] sm:$0xff] %v1990_v55 }
 0x525   : > { %2772 = shalt.err (!%p2769_p11)
}
 0x526   : > { %s2773_s29 = scalar_lea.hbm %s3625_s30, 128  ;;  %s2777_s7 = scalar_lea.hbm %s3752_s19, 256 }
 0x527   : > { %p2774_p10 = scmp.ne.s32.totalorder %s3625_s30, %s2773_s29  ;;  %p2778_p3 = scmp.lt.u32.totalorder %s3625_s30, %s3752_s19 }
 0x528   : > { %p2779_p9 = scmp.lt.u32.totalorder %s2777_s7, %s2773_s29  ;;  %p2781_p0 = scmp.lt.u32.totalorder %s2773_s29, %s3625_s30 }
 0x529   : > { %p2775_p7 = pnand %p2774_p10, %p3753_p13 }
 0x52a   : > { %p2780_p4 = por %p2779_p9, %p2778_p3 }
 0x52b   : > { %p2776_p12 = pneg %p2775_p7 }
 0x52c   : > { %p2782_p5 = por %p2781_p0, %p2780_p4 }
 0x52e   : > { %p2783_p2 = pnand %p2782_p5, %p2776_p12 }
 0x530   : > { %2786 = shalt.err (!%p2783_p2)
}
 0x531   : > { %2403 = dma.vmem_to_hbm [thread:$0]  (%p3753_p13), %s3627_s8, 128, %s3625_s30, %s1993_s10  }
 0x532 PF: > { %s3754_s13 = sld [smem:[#allocation27_spill]]  ;;  %s3755_s16 = sld [smem:[#allocation32_spill]] }
 0x533   : > { %p3757_p8 = scmp.ge.s32.totalorder %s2855_s15, 2 }
 0x538   : > { %s2019_s14 = sand.u32 1, %s3754_s13   ;;  %p3756_p6 = scmp.ne.s32.totalorder %s3755_s16, 0 }
 0x539   : > { %s2020_s24 = scalar_lea.sflag [#allocation11], %s2019_s14 }
 0x53a   : > { %p2426_p1 = pnand %p3757_p8, %p3756_p6 }
 0x53c   : > { %2830 = dma.done.wait (!%p2426_p1), %s2020_s24, 128  }
 0x53d   : > { %2832 = vsyncadd (!%p2426_p1), %s2020_s24, 4294967168  ;;  %s32_s15 = sadd.s32 1, %s2855_s15   ;;  %s3758_s27 = sld [smem:[#allocation28_spill]] }
 0x53e   : > { %p29_p11 = scmp.ge.s32.totalorder %s32_s15, 4   ;;  %s3759_s13 = sld [smem:[#allocation34_spill]] }
 0x53f   : > { %s3760_s22 = sld [smem:[#allocation33_spill]]  ;;  %s3761_s11 = smov %s2839_s12 }
 0x540   : > { %s3763_s14 = smov %s2851_s0  ;;  %31 = sbr.rel (!%p29_p11) target bundleno = 23 (0x17), region = 134 }
 0x543   : > { %s3762_s12 = smov %s3758_s27 }
 0x545   : > { %s3764_s0 = smov %s3760_s22 }
 0x547   :  { %2025 = vsyncpa [#allocation10], 1 }
 0x548   :  { %2027 = vsyncpa [#allocation10 + $0x1], 1 }
 0x549   :  { %2028 = vsyncpa [#allocation13], 1 }
 0x54a   :  { %2029 = vsyncpa [#allocation16], 1 }
 0x54b   :  { %2031 = vsyncpa [#allocation16 + $0x1], 1 }
 0x54c   :  { %2032 = vsyncpa [#allocation19], 1 }
 0x54d   :  { %2034 = vsyncpa [#allocation19 + $0x1], 1 }
 0x54e   :  { %2035 = vsyncpa [#allocation11], 1 }
 0x54f   :  { %2037 = vsyncpa [#allocation11 + $0x1], 1 }

</bundles_post_ra>
